<compile_context>
chip_gen: v6e
topology: v6e:2x2x1
jax: 0.10.0
libtpu: 0.0.40
codegen_flags: <defaults>
</compile_context>

<pallas_src>
import numpy as np

import jax
import jax.numpy as jnp
from jax import lax
from jax.experimental import pallas as pl
from jax.experimental.pallas import tpu as pltpu

NUM_CLASSES = 3
NUM_ANCHORS = 2
HEAD_C = NUM_ANCHORS * NUM_CLASSES + NUM_ANCHORS * 4   # 14 fused header channels
OUT_LANES = 128                                        # lane-dense padded header width


# ---------------------------------------------------------------------------
# Structural matrices + one-time weight restructuring (numpy, outside hot path)
# ---------------------------------------------------------------------------
def _band_select(W, kw, stride):
    """B[j*stride + kw - 1, j] = 1  (zero-padded conv column gather)."""
    Wo = W // stride
    B = np.zeros((W, Wo), np.float32)
    for j in range(Wo):
        src = j * stride + kw - 1
        if 0 <= src < W:
            B[src, j] = 1.0
    return B


def _bilinear_1d(n_in):
    """2x bilinear upsample matrix, half-pixel centers + edge clamp
    (matches PyTorch F.upsample(mode='bilinear', align_corners=False))."""
    n_out = 2 * n_in
    U = np.zeros((n_out, n_in), np.float32)
    for o in range(n_out):
        src = max((o + 0.5) * 0.5 - 0.5, 0.0)
        i0 = int(np.floor(src))
        frac = src - i0
        i1 = min(i0 + 1, n_in - 1)
        U[o, i0] += 1.0 - frac
        U[o, i1] += frac
    return U


def _conv_matrix(w_hwio, bias, W, stride, pad_out_to=None, fold_uw=None):
    """Single matrix M so that a 3x3/pad-1 conv on an (H, W*Cin) slab is
        y = [x_down | x | x_up | 1] @ M
    Bias is folded into the last row; an optional U_Wc (width upsample) matrix
    is folded into the weight rows; output columns can be zero-padded to a
    lane-dense width."""
    w = np.asarray(w_hwio, np.float32)
    b = np.asarray(bias, np.float32)
    Cout = w.shape[-1]
    Wo = W // stride
    blocks = []
    for kh in range(3):
        m_kh = sum(np.kron(_band_select(W, kw, stride), w[kh, kw]) for kw in range(3))
        if fold_uw is not None:
            m_kh = fold_uw @ m_kh          # fold the width/channel upsample
        blocks.append(m_kh)
    blocks.append(np.tile(b, Wo)[None, :])  # bias row (pairs with ones column)
    M = np.concatenate(blocks, axis=0)
    if pad_out_to is not None and M.shape[1] < pad_out_to:
        M = np.pad(M, ((0, 0), (0, pad_out_to - M.shape[1])))
    return jnp.asarray(M)


def _row_even_select(H, B):
    """kron(I_B, S) with S[i, 2i] = 1 : stride-2 output-row gather."""
    S = np.zeros((H // 2, H), np.float32)
    S[np.arange(H // 2), 2 * np.arange(H // 2)] = 1.0
    return jnp.asarray(np.kron(np.eye(B, dtype=np.float32), S))


def _row_upsample(H_small, B):
    """kron(I_B, U): 2x bilinear row interpolation for B row-stacked images."""
    return jnp.asarray(np.kron(np.eye(B, dtype=np.float32), _bilinear_1d(H_small)))


def _uw_matrix(W_small, C):
    """U_Wc with  up = A @ U_Wc : 2x bilinear width interp on a (rows, W*C) slab."""
    return np.kron(_bilinear_1d(W_small).T, np.eye(C, dtype=np.float32))


def prepare_ssd_operands(params, b_tile):
    """Restructure the conv weights into the 15 constant matrices the fused
    kernel consumes (order documented in _ssd_kernel's signature)."""
    heads = []
    for i in range(3):
        wc, bc = params["cls"][i]
        wr, br = params["reg"][i]
        heads.append((np.concatenate([np.asarray(wc), np.asarray(wr)], axis=-1),
                      np.concatenate([np.asarray(bc), np.asarray(br)], axis=0)))
    ms = [
        _conv_matrix(*params["bn0"], W=16, stride=1),                               # (193,128)
        _conv_matrix(*params["bn1"], W=16, stride=2),                               # (385, 64)
        _conv_matrix(*params["bn2"], W=8,  stride=1),                               # (193,128)
        _conv_matrix(*params["bn3"], W=8,  stride=2),                               # (385, 64)
        _conv_matrix(*params["ex0"], W=4,  stride=2),                               # (193, 32)
        _conv_matrix(*params["fpn"][1], W=4, stride=1, fold_uw=_uw_matrix(2, 16)),  # ( 97, 64)
        _conv_matrix(*params["fpn"][0], W=8, stride=1, fold_uw=_uw_matrix(4, 16)),  # (193, 64)
        _conv_matrix(*heads[0], W=8, stride=1, pad_out_to=OUT_LANES),               # (193,128)
        _conv_matrix(*heads[1], W=4, stride=1, pad_out_to=OUT_LANES),               # (193,128)
        _conv_matrix(*heads[2], W=2, stride=1, pad_out_to=OUT_LANES),               # ( 97,128)
    ]
    ss = [_row_even_select(16, b_tile),   # bn1 stride-2 row gather
          _row_even_select(8, b_tile),    # bn3
          _row_even_select(4, b_tile)]    # ex0
    us = [_row_upsample(2, b_tile),       # f2 (2x2) -> 4 rows
          _row_upsample(4, b_tile)]       # p1 (4x4) -> 8 rows
    return ms + ss + us


# ---------------------------------------------------------------------------
# The single fused Pallas kernel: whole SSD forward for B_TILE images
# ---------------------------------------------------------------------------
def _ssd_kernel(x_ref,
                m_bn0, m_bn1, m_bn2, m_bn3, m_ex0, m_fpn1, m_fpn0,
                m_h0, m_h1, m_h2, s16, s8, s4, uh2, uh4,
                out_ref):
    f32 = jnp.float32

    def shift_cat(x, H):
        """[row r-1 | row r | row r+1 | 1] with per-image zero padding.  Row
        shifts are sublane slice/concats + boundary masks (no MXU work).
        H is a power of two, rows = B_TILE * H."""
        R, L = x.shape
        row = lax.broadcasted_iota(jnp.int32, (R, L), 0)
        top = (row & (H - 1)) == 0           # r % H == 0     (image top rows)
        bot = (row & (H - 1)) == (H - 1)     # r % H == H - 1 (image bottom rows)
        zrow = jnp.zeros((1, L), x.dtype)
        down = jnp.concatenate([zrow, x[:R - 1, :]], axis=0)   # row r <- x[r-1]
        up = jnp.concatenate([x[1:, :], zrow], axis=0)         # row r <- x[r+1]
        down = jnp.where(top, jnp.zeros_like(down), down)
        up = jnp.where(bot, jnp.zeros_like(up), up)
        ones = jnp.ones((R, 1), x.dtype)
        return jnp.concatenate([down, x, up, ones], axis=-1)

    def conv(x, H, m_ref, relu=True, sel_ref=None):
        xc = shift_cat(x, H)
        if sel_ref is not None:              # stride-2: even-output-row gather
            xc = jnp.dot(sel_ref[...], xc, preferred_element_type=f32)
        y = jnp.dot(xc, m_ref[...], preferred_element_type=f32)
        return jnp.maximum(y, 0.0) if relu else y

    # --- base net + extras (compute_features) ---
    x = x_ref[...]                                   # (B*16,  64)  16x16x4
    a = conv(x, 16, m_bn0)                           # (B*16, 128)  16x16x8
    f0 = conv(a, 16, m_bn1, sel_ref=s16)             # (B*8,   64)   8x8x8   feature 0
    a = conv(f0, 8, m_bn2)                           # (B*8,  128)   8x8x16
    f1 = conv(a, 8, m_bn3, sel_ref=s8)               # (B*4,   64)   4x4x16  feature 1
    f2 = conv(f1, 4, m_ex0, sel_ref=s4)              # (B*2,   32)   2x2x16  feature 2

    # --- FPN top-down (compute_fpn_features); U_Wc folded into m_fpn* ---
    a = jnp.dot(uh2[...], f2, preferred_element_type=f32)     # rows 2 -> 4
    p1 = f1 + conv(a, 4, m_fpn1, relu=False)                  # (B*4, 64)
    a = jnp.dot(uh4[...], p1, preferred_element_type=f32)     # rows 4 -> 8
    p0 = f0 + conv(a, 8, m_fpn0, relu=False)                  # (B*8, 64)

    # --- fused cls+reg headers, packed into one lane-dense (B*14, 128) slab ---
    h0 = conv(p0, 8, m_h0, relu=False)               # (B*8, 128)
    h1 = conv(p1, 4, m_h1, relu=False)               # (B*4, 128)
    h2 = conv(f2, 2, m_h2, relu=False)               # (B*2, 128)
    out_ref[...] = jnp.concatenate([h0, h1, h2], axis=0)


# ---------------------------------------------------------------------------
# Forward wrapper: one pallas_call + output permute/view glue
# ---------------------------------------------------------------------------
def _pick_b_tile(n):
    for b in (8, 4, 2, 1):
        if n % b == 0:
            return b
    return 1


def ssd_forward(x_nchw, weights, b_tile):
    N, Cin, H, W = x_nchw.shape
    assert N % b_tile == 0
    steps = N // b_tile
    x2d = jnp.transpose(x_nchw, (0, 2, 3, 1)).astype(jnp.float32)
    x2d = x2d.reshape(steps, b_tile * H, W * Cin)

    in_specs = [pl.BlockSpec((None, b_tile * H, W * Cin), lambda i: (i, 0, 0))]
    in_specs += [pl.BlockSpec(w.shape, lambda i: (0, 0)) for w in weights]

    out_rows = b_tile * (8 + 4 + 2)
    packed = pl.pallas_call(
        _ssd_kernel,
        out_shape=jax.ShapeDtypeStruct((steps, out_rows, OUT_LANES), jnp.float32),
        grid_spec=pltpu.PrefetchScalarGridSpec(
            num_scalar_prefetch=0,
            grid=(steps,),
            in_specs=in_specs,
            out_specs=pl.BlockSpec((None, out_rows, OUT_LANES), lambda i: (i, 0, 0))),
        compiler_params=pltpu.CompilerParams(
            dimension_semantics=("parallel",)),
    )(x2d, *weights)

    # Output glue (equivalent of permute(0,2,3,1).view(...) + cat in PyTorch).
    B = b_tile
    r0, r1 = B * 8, B * 4
    h0 = packed[:, :r0, :8 * HEAD_C].reshape(N, 8, 8, HEAD_C)
    h1 = packed[:, r0:r0 + r1, :4 * HEAD_C].reshape(N, 4, 4, HEAD_C)
    h2 = packed[:, r0 + r1:, :2 * HEAD_C].reshape(N, 2, 2, HEAD_C)
    confs, locs = [], []
    nc = NUM_ANCHORS * NUM_CLASSES
    for hmap, (Hf, Wf) in ((h0, (8, 8)), (h1, (4, 4)), (h2, (2, 2))):
        confs.append(hmap[..., :nc].reshape(N, Hf * Wf * NUM_ANCHORS, NUM_CLASSES))
        locs.append(hmap[..., nc:].reshape(N, Hf * Wf * NUM_ANCHORS, 4))
    # TODO(synk): is_test branch (softmax + box_utils.convert_locations_to_boxes
    # with config.priors) is not implemented since no priors/config are provided.
    return jnp.concatenate(confs, axis=1), jnp.concatenate(locs, axis=1)


# ---------------------------------------------------------------------------
# Plain-XLA reference of the same forward (used only for the self-check)
# ---------------------------------------------------------------------------
def _up2_ref(x_nhwc):
    n, h, w, c = x_nhwc.shape
    uh = jnp.asarray(_bilinear_1d(h))
    uw = jnp.asarray(_bilinear_1d(w))
    return jnp.einsum('oh,nhwc,pw->nopc', uh, x_nhwc, uw,
                      precision=lax.Precision.HIGHEST)


def _ref_forward(x_nchw, params):
    hp = lax.Precision.HIGHEST
    x = jnp.transpose(x_nchw, (0, 2, 3, 1))

    def conv(t, wb, stride, relu):
        w, b = wb
        y = lax.conv_general_dilated(t, w, (stride, stride), [(1, 1), (1, 1)],
                                     dimension_numbers=('NHWC', 'HWIO', 'NHWC'),
                                     precision=hp) + b
        return jnp.maximum(y, 0.0) if relu else y

    a = conv(x, params["bn0"], 1, True)
    f0 = conv(a, params["bn1"], 2, True)
    a = conv(f0, params["bn2"], 1, True)
    f1 = conv(a, params["bn3"], 2, True)
    f2 = conv(f1, params["ex0"], 2, True)
    p1 = f1 + conv(_up2_ref(f2), params["fpn"][1], 1, False)
    p0 = f0 + conv(_up2_ref(p1), params["fpn"][0], 1, False)
    confs, locs = [], []
    for feat, cls_wb, reg_wb in zip((p0, p1, f2), params["cls"], params["reg"]):
        c = conv(feat, cls_wb, 1, False)
        l = conv(feat, reg_wb, 1, False)
        n, hf, wf, _ = c.shape
        confs.append(c.reshape(n, hf * wf * NUM_ANCHORS, NUM_CLASSES))
        locs.append(l.reshape(n, hf * wf * NUM_ANCHORS, 4))
    return jnp.concatenate(confs, 1), jnp.concatenate(locs, 1)


# ---------------------------------------------------------------------------
# Deterministic parameter init (xavier-uniform-like), HWIO conv weights
# ---------------------------------------------------------------------------
def _xavier_conv(key, cin, cout):
    kw, kb = jax.random.split(key)
    fan_in, fan_out = cin * 9, cout * 9
    limit = (6.0 / (fan_in + fan_out)) ** 0.5
    w = jax.random.uniform(kw, (3, 3, cin, cout), jnp.float32, -limit, limit)
    b = jax.random.uniform(kb, (cout,), jnp.float32, -0.1, 0.1)
    return (w, b)


def make_params(key):
    keys = jax.random.split(key, 16)
    header_in = [8, 16, 16]  # channels of the three source features
    return {
        "bn0": _xavier_conv(keys[0], 4, 8),
        "bn1": _xavier_conv(keys[1], 8, 8),
        "bn2": _xavier_conv(keys[2], 8, 16),
        "bn3": _xavier_conv(keys[3], 16, 16),
        "ex0": _xavier_conv(keys[4], 16, 16),
        # fpn[i]: get_in_channels(headers[i+1]) -> get_in_channels(headers[i])
        "fpn": [
            _xavier_conv(keys[5], header_in[1], header_in[0]),   # 16 -> 8
            _xavier_conv(keys[6], header_in[2], header_in[1]),   # 16 -> 16
        ],
        "cls": [
            _xavier_conv(keys[7], header_in[0], NUM_ANCHORS * NUM_CLASSES),
            _xavier_conv(keys[8], header_in[1], NUM_ANCHORS * NUM_CLASSES),
            _xavier_conv(keys[9], header_in[2], NUM_ANCHORS * NUM_CLASSES),
        ],
        "reg": [
            _xavier_conv(keys[10], header_in[0], NUM_ANCHORS * 4),
            _xavier_conv(keys[11], header_in[1], NUM_ANCHORS * 4),
            _xavier_conv(keys[12], header_in[2], NUM_ANCHORS * 4),
        ],
    }


if __name__ == "__main__":
    key = jax.random.PRNGKey(0)
    kx, kp = jax.random.split(key)
    x = jax.random.normal(kx, (2, 4, 16, 16), jnp.float32)   # NCHW like PyTorch
    params = make_params(kp)

    b_tile = _pick_b_tile(x.shape[0])                 # images folded per grid step
    weights = prepare_ssd_operands(params, b_tile)    # one-time weight restructuring

    fwd = jax.jit(ssd_forward, static_argnums=2)
    confidences, locations = fwd(x, weights, b_tile)
    jax.block_until_ready((confidences, locations))

    total_anchors = (8 * 8 + 4 * 4 + 2 * 2) * NUM_ANCHORS  # 168
    assert confidences.shape == (2, total_anchors, NUM_CLASSES), confidences.shape
    assert locations.shape == (2, total_anchors, 4), locations.shape

    # Self-check against a plain-XLA reference of the same forward (loose
    # tolerance to allow for MXU matmul precision differences).
    ref_conf, ref_loc = _ref_forward(x, params)
    np.testing.assert_allclose(np.asarray(confidences), np.asarray(ref_conf),
                               rtol=5e-2, atol=5e-2)
    np.testing.assert_allclose(np.asarray(locations), np.asarray(ref_loc),
                               rtol=5e-2, atol=5e-2)
    print("KERNEL_OK")
</pallas_src>

<mosaic_0001>
module attributes {stable_mosaic.version = 11 : i64} {
  func.func @_ssd_kernel(%arg0: i32, %arg1: memref<1x32x64xf32, #tpu.memory_space<vmem>>, %arg2: memref<193x128xf32, #tpu.memory_space<vmem>>, %arg3: memref<385x64xf32, #tpu.memory_space<vmem>>, %arg4: memref<193x128xf32, #tpu.memory_space<vmem>>, %arg5: memref<385x64xf32, #tpu.memory_space<vmem>>, %arg6: memref<193x32xf32, #tpu.memory_space<vmem>>, %arg7: memref<97x64xf32, #tpu.memory_space<vmem>>, %arg8: memref<193x64xf32, #tpu.memory_space<vmem>>, %arg9: memref<193x128xf32, #tpu.memory_space<vmem>>, %arg10: memref<193x128xf32, #tpu.memory_space<vmem>>, %arg11: memref<97x128xf32, #tpu.memory_space<vmem>>, %arg12: memref<16x32xf32, #tpu.memory_space<vmem>>, %arg13: memref<8x16xf32, #tpu.memory_space<vmem>>, %arg14: memref<4x8xf32, #tpu.memory_space<vmem>>, %arg15: memref<8x4xf32, #tpu.memory_space<vmem>>, %arg16: memref<16x8xf32, #tpu.memory_space<vmem>>, %arg17: memref<1x28x128xf32, #tpu.memory_space<vmem>>) attributes {dimension_semantics = [#tpu.dimension_semantics<parallel>], iteration_bounds = array<i64: 1>, scalar_prefetch = 0 : i64, scratch_operands = 0 : i64, tpu.core_type = #tpu.core_type<tc>, window_params = [{transform_indices = @transform_0, window_bounds = array<i64: 1, 32, 64>}, {pipeline_mode = #tpu.pipeline_mode<synchronous>, transform_indices = @transform_1, window_bounds = array<i64: 193, 128>}, {pipeline_mode = #tpu.pipeline_mode<synchronous>, transform_indices = @transform_2, window_bounds = array<i64: 385, 64>}, {pipeline_mode = #tpu.pipeline_mode<synchronous>, transform_indices = @transform_3, window_bounds = array<i64: 193, 128>}, {pipeline_mode = #tpu.pipeline_mode<synchronous>, transform_indices = @transform_4, window_bounds = array<i64: 385, 64>}, {pipeline_mode = #tpu.pipeline_mode<synchronous>, transform_indices = @transform_5, window_bounds = array<i64: 193, 32>}, {pipeline_mode = #tpu.pipeline_mode<synchronous>, transform_indices = @transform_6, window_bounds = array<i64: 97, 64>}, {pipeline_mode = #tpu.pipeline_mode<synchronous>, transform_indices = @transform_7, window_bounds = array<i64: 193, 64>}, {pipeline_mode = #tpu.pipeline_mode<synchronous>, transform_indices = @transform_8, window_bounds = array<i64: 193, 128>}, {pipeline_mode = #tpu.pipeline_mode<synchronous>, transform_indices = @transform_9, window_bounds = array<i64: 193, 128>}, {pipeline_mode = #tpu.pipeline_mode<synchronous>, transform_indices = @transform_10, window_bounds = array<i64: 97, 128>}, {pipeline_mode = #tpu.pipeline_mode<synchronous>, transform_indices = @transform_11, window_bounds = array<i64: 16, 32>}, {pipeline_mode = #tpu.pipeline_mode<synchronous>, transform_indices = @transform_12, window_bounds = array<i64: 8, 16>}, {pipeline_mode = #tpu.pipeline_mode<synchronous>, transform_indices = @transform_13, window_bounds = array<i64: 4, 8>}, {pipeline_mode = #tpu.pipeline_mode<synchronous>, transform_indices = @transform_14, window_bounds = array<i64: 8, 4>}, {pipeline_mode = #tpu.pipeline_mode<synchronous>, transform_indices = @transform_15, window_bounds = array<i64: 16, 8>}, {transform_indices = @transform_16, window_bounds = array<i64: 1, 28, 128>}]} {
    %c0 = arith.constant 0 : index
    %c0_0 = arith.constant 0 : index
    %c0_1 = arith.constant 0 : index
    %0 = vector.load %arg1[%c0, %c0_0, %c0_1] : memref<1x32x64xf32, #tpu.memory_space<vmem>>, vector<1x32x64xf32>
    %1 = vector.shape_cast %0 : vector<1x32x64xf32> to vector<32x64xf32>
    %2 = tpu.iota {dimensions = array<i32: 0>} : vector<32x64xi32>
    %c15_i32 = arith.constant 15 : i32
    %3 = vector.broadcast %c15_i32 : i32 to vector<32x64xi32>
    %4 = arith.andi %2, %3 : vector<32x64xi32>
    %c0_i32 = arith.constant 0 : i32
    %5 = vector.broadcast %c0_i32 : i32 to vector<32x64xi32>
    %6 = arith.cmpi eq, %4, %5 : vector<32x64xi32>
    %c15_i32_2 = arith.constant 15 : i32
    %7 = vector.broadcast %c15_i32_2 : i32 to vector<32x64xi32>
    %8 = arith.andi %2, %7 : vector<32x64xi32>
    %c15_i32_3 = arith.constant 15 : i32
    %9 = vector.broadcast %c15_i32_3 : i32 to vector<32x64xi32>
    %10 = arith.cmpi eq, %8, %9 : vector<32x64xi32>
    %cst = arith.constant 0.000000e+00 : f32
    %11 = vector.broadcast %cst : f32 to vector<1x64xf32>
    %12 = vector.extract_strided_slice %1 {offsets = [0, 0], sizes = [31, 64], strides = [1, 1]} : vector<32x64xf32> to vector<31x64xf32>
    %13 = tpu.concatenate %11, %12 in 0 : vector<1x64xf32>, vector<31x64xf32> -> vector<32x64xf32>
    %14 = vector.extract_strided_slice %1 {offsets = [1, 0], sizes = [31, 64], strides = [1, 1]} : vector<32x64xf32> to vector<31x64xf32>
    %15 = tpu.concatenate %14, %11 in 0 : vector<31x64xf32>, vector<1x64xf32> -> vector<32x64xf32>
    %cst_4 = arith.constant 0.000000e+00 : f32
    %16 = vector.broadcast %cst_4 : f32 to vector<32x64xf32>
    %17 = arith.select %6, %16, %13 : vector<32x64xi1>, vector<32x64xf32>
    %cst_5 = arith.constant 0.000000e+00 : f32
    %18 = vector.broadcast %cst_5 : f32 to vector<32x64xf32>
    %19 = arith.select %10, %18, %15 : vector<32x64xi1>, vector<32x64xf32>
    %cst_6 = arith.constant 1.000000e+00 : f32
    %20 = vector.broadcast %cst_6 : f32 to vector<32x1xf32>
    %21 = tpu.concatenate %17, %1, %19, %20 in 1 : vector<32x64xf32>, vector<32x64xf32>, vector<32x64xf32>, vector<32x1xf32> -> vector<32x193xf32>
    %c0_7 = arith.constant 0 : index
    %c0_8 = arith.constant 0 : index
    %22 = vector.load %arg2[%c0_7, %c0_8] : memref<193x128xf32, #tpu.memory_space<vmem>>, vector<193x128xf32>
    %cst_9 = arith.constant dense<0.000000e+00> : vector<32x128xf32>
    %23 = tpu.matmul %21, %22, %cst_9 {dimension_numbers = #tpu.dot_dimension_numbers<[1], [0], [0], [1], [0, 0, 1, 1], [], []>} : vector<32x193xf32>, vector<193x128xf32>, vector<32x128xf32> -> vector<32x128xf32>
    %cst_10 = arith.constant 0.000000e+00 : f32
    %24 = vector.broadcast %cst_10 : f32 to vector<32x128xf32>
    %25 = arith.maximumf %23, %24 : vector<32x128xf32>
    %26 = tpu.iota {dimensions = array<i32: 0>} : vector<32x128xi32>
    %c15_i32_11 = arith.constant 15 : i32
    %27 = vector.broadcast %c15_i32_11 : i32 to vector<32x128xi32>
    %28 = arith.andi %26, %27 : vector<32x128xi32>
    %c0_i32_12 = arith.constant 0 : i32
    %29 = vector.broadcast %c0_i32_12 : i32 to vector<32x128xi32>
    %30 = arith.cmpi eq, %28, %29 : vector<32x128xi32>
    %c15_i32_13 = arith.constant 15 : i32
    %31 = vector.broadcast %c15_i32_13 : i32 to vector<32x128xi32>
    %32 = arith.andi %26, %31 : vector<32x128xi32>
    %c15_i32_14 = arith.constant 15 : i32
    %33 = vector.broadcast %c15_i32_14 : i32 to vector<32x128xi32>
    %34 = arith.cmpi eq, %32, %33 : vector<32x128xi32>
    %cst_15 = arith.constant 0.000000e+00 : f32
    %35 = vector.broadcast %cst_15 : f32 to vector<1x128xf32>
    %36 = vector.extract_strided_slice %25 {offsets = [0, 0], sizes = [31, 128], strides = [1, 1]} : vector<32x128xf32> to vector<31x128xf32>
    %37 = tpu.concatenate %35, %36 in 0 : vector<1x128xf32>, vector<31x128xf32> -> vector<32x128xf32>
    %38 = vector.extract_strided_slice %25 {offsets = [1, 0], sizes = [31, 128], strides = [1, 1]} : vector<32x128xf32> to vector<31x128xf32>
    %39 = tpu.concatenate %38, %35 in 0 : vector<31x128xf32>, vector<1x128xf32> -> vector<32x128xf32>
    %cst_16 = arith.constant 0.000000e+00 : f32
    %40 = vector.broadcast %cst_16 : f32 to vector<32x128xf32>
    %41 = arith.select %30, %40, %37 : vector<32x128xi1>, vector<32x128xf32>
    %cst_17 = arith.constant 0.000000e+00 : f32
    %42 = vector.broadcast %cst_17 : f32 to vector<32x128xf32>
    %43 = arith.select %34, %42, %39 : vector<32x128xi1>, vector<32x128xf32>
    %cst_18 = arith.constant 1.000000e+00 : f32
    %44 = vector.broadcast %cst_18 : f32 to vector<32x1xf32>
    %45 = tpu.concatenate %41, %25, %43, %44 in 1 : vector<32x128xf32>, vector<32x128xf32>, vector<32x128xf32>, vector<32x1xf32> -> vector<32x385xf32>
    %c0_19 = arith.constant 0 : index
    %c0_20 = arith.constant 0 : index
    %46 = vector.load %arg12[%c0_19, %c0_20] : memref<16x32xf32, #tpu.memory_space<vmem>>, vector<16x32xf32>
    %cst_21 = arith.constant dense<0.000000e+00> : vector<16x385xf32>
    %47 = tpu.matmul %46, %45, %cst_21 {dimension_numbers = #tpu.dot_dimension_numbers<[1], [0], [0], [1], [0, 0, 1, 1], [], []>} : vector<16x32xf32>, vector<32x385xf32>, vector<16x385xf32> -> vector<16x385xf32>
    %c0_22 = arith.constant 0 : index
    %c0_23 = arith.constant 0 : index
    %48 = vector.load %arg3[%c0_22, %c0_23] : memref<385x64xf32, #tpu.memory_space<vmem>>, vector<385x64xf32>
    %cst_24 = arith.constant dense<0.000000e+00> : vector<16x64xf32>
    %49 = tpu.matmul %47, %48, %cst_24 {dimension_numbers = #tpu.dot_dimension_numbers<[1], [0], [0], [1], [0, 0, 1, 1], [], []>} : vector<16x385xf32>, vector<385x64xf32>, vector<16x64xf32> -> vector<16x64xf32>
    %cst_25 = arith.constant 0.000000e+00 : f32
    %50 = vector.broadcast %cst_25 : f32 to vector<16x64xf32>
    %51 = arith.maximumf %49, %50 : vector<16x64xf32>
    %52 = tpu.iota {dimensions = array<i32: 0>} : vector<16x64xi32>
    %c7_i32 = arith.constant 7 : i32
    %53 = vector.broadcast %c7_i32 : i32 to vector<16x64xi32>
    %54 = arith.andi %52, %53 : vector<16x64xi32>
    %c0_i32_26 = arith.constant 0 : i32
    %55 = vector.broadcast %c0_i32_26 : i32 to vector<16x64xi32>
    %56 = arith.cmpi eq, %54, %55 : vector<16x64xi32>
    %c7_i32_27 = arith.constant 7 : i32
    %57 = vector.broadcast %c7_i32_27 : i32 to vector<16x64xi32>
    %58 = arith.andi %52, %57 : vector<16x64xi32>
    %c7_i32_28 = arith.constant 7 : i32
    %59 = vector.broadcast %c7_i32_28 : i32 to vector<16x64xi32>
    %60 = arith.cmpi eq, %58, %59 : vector<16x64xi32>
    %cst_29 = arith.constant 0.000000e+00 : f32
    %61 = vector.broadcast %cst_29 : f32 to vector<1x64xf32>
    %62 = vector.extract_strided_slice %51 {offsets = [0, 0], sizes = [15, 64], strides = [1, 1]} : vector<16x64xf32> to vector<15x64xf32>
    %63 = tpu.concatenate %61, %62 in 0 : vector<1x64xf32>, vector<15x64xf32> -> vector<16x64xf32>
    %64 = vector.extract_strided_slice %51 {offsets = [1, 0], sizes = [15, 64], strides = [1, 1]} : vector<16x64xf32> to vector<15x64xf32>
    %65 = tpu.concatenate %64, %61 in 0 : vector<15x64xf32>, vector<1x64xf32> -> vector<16x64xf32>
    %cst_30 = arith.constant 0.000000e+00 : f32
    %66 = vector.broadcast %cst_30 : f32 to vector<16x64xf32>
    %67 = arith.select %56, %66, %63 : vector<16x64xi1>, vector<16x64xf32>
    %cst_31 = arith.constant 0.000000e+00 : f32
    %68 = vector.broadcast %cst_31 : f32 to vector<16x64xf32>
    %69 = arith.select %60, %68, %65 : vector<16x64xi1>, vector<16x64xf32>
    %cst_32 = arith.constant 1.000000e+00 : f32
    %70 = vector.broadcast %cst_32 : f32 to vector<16x1xf32>
    %71 = tpu.concatenate %67, %51, %69, %70 in 1 : vector<16x64xf32>, vector<16x64xf32>, vector<16x64xf32>, vector<16x1xf32> -> vector<16x193xf32>
    %c0_33 = arith.constant 0 : index
    %c0_34 = arith.constant 0 : index
    %72 = vector.load %arg4[%c0_33, %c0_34] : memref<193x128xf32, #tpu.memory_space<vmem>>, vector<193x128xf32>
    %cst_35 = arith.constant dense<0.000000e+00> : vector<16x128xf32>
    %73 = tpu.matmul %71, %72, %cst_35 {dimension_numbers = #tpu.dot_dimension_numbers<[1], [0], [0], [1], [0, 0, 1, 1], [], []>} : vector<16x193xf32>, vector<193x128xf32>, vector<16x128xf32> -> vector<16x128xf32>
    %cst_36 = arith.constant 0.000000e+00 : f32
    %74 = vector.broadcast %cst_36 : f32 to vector<16x128xf32>
    %75 = arith.maximumf %73, %74 : vector<16x128xf32>
    %76 = tpu.iota {dimensions = array<i32: 0>} : vector<16x128xi32>
    %c7_i32_37 = arith.constant 7 : i32
    %77 = vector.broadcast %c7_i32_37 : i32 to vector<16x128xi32>
    %78 = arith.andi %76, %77 : vector<16x128xi32>
    %c0_i32_38 = arith.constant 0 : i32
    %79 = vector.broadcast %c0_i32_38 : i32 to vector<16x128xi32>
    %80 = arith.cmpi eq, %78, %79 : vector<16x128xi32>
    %c7_i32_39 = arith.constant 7 : i32
    %81 = vector.broadcast %c7_i32_39 : i32 to vector<16x128xi32>
    %82 = arith.andi %76, %81 : vector<16x128xi32>
    %c7_i32_40 = arith.constant 7 : i32
    %83 = vector.broadcast %c7_i32_40 : i32 to vector<16x128xi32>
    %84 = arith.cmpi eq, %82, %83 : vector<16x128xi32>
    %cst_41 = arith.constant 0.000000e+00 : f32
    %85 = vector.broadcast %cst_41 : f32 to vector<1x128xf32>
    %86 = vector.extract_strided_slice %75 {offsets = [0, 0], sizes = [15, 128], strides = [1, 1]} : vector<16x128xf32> to vector<15x128xf32>
    %87 = tpu.concatenate %85, %86 in 0 : vector<1x128xf32>, vector<15x128xf32> -> vector<16x128xf32>
    %88 = vector.extract_strided_slice %75 {offsets = [1, 0], sizes = [15, 128], strides = [1, 1]} : vector<16x128xf32> to vector<15x128xf32>
    %89 = tpu.concatenate %88, %85 in 0 : vector<15x128xf32>, vector<1x128xf32> -> vector<16x128xf32>
    %cst_42 = arith.constant 0.000000e+00 : f32
    %90 = vector.broadcast %cst_42 : f32 to vector<16x128xf32>
    %91 = arith.select %80, %90, %87 : vector<16x128xi1>, vector<16x128xf32>
    %cst_43 = arith.constant 0.000000e+00 : f32
    %92 = vector.broadcast %cst_43 : f32 to vector<16x128xf32>
    %93 = arith.select %84, %92, %89 : vector<16x128xi1>, vector<16x128xf32>
    %cst_44 = arith.constant 1.000000e+00 : f32
    %94 = vector.broadcast %cst_44 : f32 to vector<16x1xf32>
    %95 = tpu.concatenate %91, %75, %93, %94 in 1 : vector<16x128xf32>, vector<16x128xf32>, vector<16x128xf32>, vector<16x1xf32> -> vector<16x385xf32>
    %c0_45 = arith.constant 0 : index
    %c0_46 = arith.constant 0 : index
    %96 = vector.load %arg13[%c0_45, %c0_46] : memref<8x16xf32, #tpu.memory_space<vmem>>, vector<8x16xf32>
    %cst_47 = arith.constant dense<0.000000e+00> : vector<8x385xf32>
    %97 = tpu.matmul %96, %95, %cst_47 {dimension_numbers = #tpu.dot_dimension_numbers<[1], [0], [0], [1], [0, 0, 1, 1], [], []>} : vector<8x16xf32>, vector<16x385xf32>, vector<8x385xf32> -> vector<8x385xf32>
    %c0_48 = arith.constant 0 : index
    %c0_49 = arith.constant 0 : index
    %98 = vector.load %arg5[%c0_48, %c0_49] : memref<385x64xf32, #tpu.memory_space<vmem>>, vector<385x64xf32>
    %cst_50 = arith.constant dense<0.000000e+00> : vector<8x64xf32>
    %99 = tpu.matmul %97, %98, %cst_50 {dimension_numbers = #tpu.dot_dimension_numbers<[1], [0], [0], [1], [0, 0, 1, 1], [], []>} : vector<8x385xf32>, vector<385x64xf32>, vector<8x64xf32> -> vector<8x64xf32>
    %cst_51 = arith.constant 0.000000e+00 : f32
    %100 = vector.broadcast %cst_51 : f32 to vector<8x64xf32>
    %101 = arith.maximumf %99, %100 : vector<8x64xf32>
    %102 = tpu.iota {dimensions = array<i32: 0>} : vector<8x64xi32>
    %c3_i32 = arith.constant 3 : i32
    %103 = vector.broadcast %c3_i32 : i32 to vector<8x64xi32>
    %104 = arith.andi %102, %103 : vector<8x64xi32>
    %c0_i32_52 = arith.constant 0 : i32
    %105 = vector.broadcast %c0_i32_52 : i32 to vector<8x64xi32>
    %106 = arith.cmpi eq, %104, %105 : vector<8x64xi32>
    %c3_i32_53 = arith.constant 3 : i32
    %107 = vector.broadcast %c3_i32_53 : i32 to vector<8x64xi32>
    %108 = arith.andi %102, %107 : vector<8x64xi32>
    %c3_i32_54 = arith.constant 3 : i32
    %109 = vector.broadcast %c3_i32_54 : i32 to vector<8x64xi32>
    %110 = arith.cmpi eq, %108, %109 : vector<8x64xi32>
    %cst_55 = arith.constant 0.000000e+00 : f32
    %111 = vector.broadcast %cst_55 : f32 to vector<1x64xf32>
    %112 = vector.extract_strided_slice %101 {offsets = [0, 0], sizes = [7, 64], strides = [1, 1]} : vector<8x64xf32> to vector<7x64xf32>
    %113 = tpu.concatenate %111, %112 in 0 : vector<1x64xf32>, vector<7x64xf32> -> vector<8x64xf32>
    %114 = vector.extract_strided_slice %101 {offsets = [1, 0], sizes = [7, 64], strides = [1, 1]} : vector<8x64xf32> to vector<7x64xf32>
    %115 = tpu.concatenate %114, %111 in 0 : vector<7x64xf32>, vector<1x64xf32> -> vector<8x64xf32>
    %cst_56 = arith.constant 0.000000e+00 : f32
    %116 = vector.broadcast %cst_56 : f32 to vector<8x64xf32>
    %117 = arith.select %106, %116, %113 : vector<8x64xi1>, vector<8x64xf32>
    %cst_57 = arith.constant 0.000000e+00 : f32
    %118 = vector.broadcast %cst_57 : f32 to vector<8x64xf32>
    %119 = arith.select %110, %118, %115 : vector<8x64xi1>, vector<8x64xf32>
    %cst_58 = arith.constant 1.000000e+00 : f32
    %120 = vector.broadcast %cst_58 : f32 to vector<8x1xf32>
    %121 = tpu.concatenate %117, %101, %119, %120 in 1 : vector<8x64xf32>, vector<8x64xf32>, vector<8x64xf32>, vector<8x1xf32> -> vector<8x193xf32>
    %c0_59 = arith.constant 0 : index
    %c0_60 = arith.constant 0 : index
    %122 = vector.load %arg14[%c0_59, %c0_60] : memref<4x8xf32, #tpu.memory_space<vmem>>, vector<4x8xf32>
    %cst_61 = arith.constant dense<0.000000e+00> : vector<4x193xf32>
    %123 = tpu.matmul %122, %121, %cst_61 {dimension_numbers = #tpu.dot_dimension_numbers<[1], [0], [0], [1], [0, 0, 1, 1], [], []>} : vector<4x8xf32>, vector<8x193xf32>, vector<4x193xf32> -> vector<4x193xf32>
    %c0_62 = arith.constant 0 : index
    %c0_63 = arith.constant 0 : index
    %124 = vector.load %arg6[%c0_62, %c0_63] : memref<193x32xf32, #tpu.memory_space<vmem>>, vector<193x32xf32>
    %cst_64 = arith.constant dense<0.000000e+00> : vector<4x32xf32>
    %125 = tpu.matmul %123, %124, %cst_64 {dimension_numbers = #tpu.dot_dimension_numbers<[1], [0], [0], [1], [0, 0, 1, 1], [], []>} : vector<4x193xf32>, vector<193x32xf32>, vector<4x32xf32> -> vector<4x32xf32>
    %cst_65 = arith.constant 0.000000e+00 : f32
    %126 = vector.broadcast %cst_65 : f32 to vector<4x32xf32>
    %127 = arith.maximumf %125, %126 : vector<4x32xf32>
    %c0_66 = arith.constant 0 : index
    %c0_67 = arith.constant 0 : index
    %128 = vector.load %arg15[%c0_66, %c0_67] : memref<8x4xf32, #tpu.memory_space<vmem>>, vector<8x4xf32>
    %cst_68 = arith.constant dense<0.000000e+00> : vector<8x32xf32>
    %129 = tpu.matmul %128, %127, %cst_68 {dimension_numbers = #tpu.dot_dimension_numbers<[1], [0], [0], [1], [0, 0, 1, 1], [], []>} : vector<8x4xf32>, vector<4x32xf32>, vector<8x32xf32> -> vector<8x32xf32>
    %130 = tpu.iota {dimensions = array<i32: 0>} : vector<8x32xi32>
    %c3_i32_69 = arith.constant 3 : i32
    %131 = vector.broadcast %c3_i32_69 : i32 to vector<8x32xi32>
    %132 = arith.andi %130, %131 : vector<8x32xi32>
    %c0_i32_70 = arith.constant 0 : i32
    %133 = vector.broadcast %c0_i32_70 : i32 to vector<8x32xi32>
    %134 = arith.cmpi eq, %132, %133 : vector<8x32xi32>
    %c3_i32_71 = arith.constant 3 : i32
    %135 = vector.broadcast %c3_i32_71 : i32 to vector<8x32xi32>
    %136 = arith.andi %130, %135 : vector<8x32xi32>
    %c3_i32_72 = arith.constant 3 : i32
    %137 = vector.broadcast %c3_i32_72 : i32 to vector<8x32xi32>
    %138 = arith.cmpi eq, %136, %137 : vector<8x32xi32>
    %cst_73 = arith.constant 0.000000e+00 : f32
    %139 = vector.broadcast %cst_73 : f32 to vector<1x32xf32>
    %140 = vector.extract_strided_slice %129 {offsets = [0, 0], sizes = [7, 32], strides = [1, 1]} : vector<8x32xf32> to vector<7x32xf32>
    %141 = tpu.concatenate %139, %140 in 0 : vector<1x32xf32>, vector<7x32xf32> -> vector<8x32xf32>
    %142 = vector.extract_strided_slice %129 {offsets = [1, 0], sizes = [7, 32], strides = [1, 1]} : vector<8x32xf32> to vector<7x32xf32>
    %143 = tpu.concatenate %142, %139 in 0 : vector<7x32xf32>, vector<1x32xf32> -> vector<8x32xf32>
    %cst_74 = arith.constant 0.000000e+00 : f32
    %144 = vector.broadcast %cst_74 : f32 to vector<8x32xf32>
    %145 = arith.select %134, %144, %141 : vector<8x32xi1>, vector<8x32xf32>
    %cst_75 = arith.constant 0.000000e+00 : f32
    %146 = vector.broadcast %cst_75 : f32 to vector<8x32xf32>
    %147 = arith.select %138, %146, %143 : vector<8x32xi1>, vector<8x32xf32>
    %cst_76 = arith.constant 1.000000e+00 : f32
    %148 = vector.broadcast %cst_76 : f32 to vector<8x1xf32>
    %149 = tpu.concatenate %145, %129, %147, %148 in 1 : vector<8x32xf32>, vector<8x32xf32>, vector<8x32xf32>, vector<8x1xf32> -> vector<8x97xf32>
    %c0_77 = arith.constant 0 : index
    %c0_78 = arith.constant 0 : index
    %150 = vector.load %arg7[%c0_77, %c0_78] : memref<97x64xf32, #tpu.memory_space<vmem>>, vector<97x64xf32>
    %cst_79 = arith.constant dense<0.000000e+00> : vector<8x64xf32>
    %151 = tpu.matmul %149, %150, %cst_79 {dimension_numbers = #tpu.dot_dimension_numbers<[1], [0], [0], [1], [0, 0, 1, 1], [], []>} : vector<8x97xf32>, vector<97x64xf32>, vector<8x64xf32> -> vector<8x64xf32>
    %152 = arith.addf %101, %151 : vector<8x64xf32>
    %c0_80 = arith.constant 0 : index
    %c0_81 = arith.constant 0 : index
    %153 = vector.load %arg16[%c0_80, %c0_81] : memref<16x8xf32, #tpu.memory_space<vmem>>, vector<16x8xf32>
    %cst_82 = arith.constant dense<0.000000e+00> : vector<16x64xf32>
    %154 = tpu.matmul %153, %152, %cst_82 {dimension_numbers = #tpu.dot_dimension_numbers<[1], [0], [0], [1], [0, 0, 1, 1], [], []>} : vector<16x8xf32>, vector<8x64xf32>, vector<16x64xf32> -> vector<16x64xf32>
    %155 = tpu.iota {dimensions = array<i32: 0>} : vector<16x64xi32>
    %c7_i32_83 = arith.constant 7 : i32
    %156 = vector.broadcast %c7_i32_83 : i32 to vector<16x64xi32>
    %157 = arith.andi %155, %156 : vector<16x64xi32>
    %c0_i32_84 = arith.constant 0 : i32
    %158 = vector.broadcast %c0_i32_84 : i32 to vector<16x64xi32>
    %159 = arith.cmpi eq, %157, %158 : vector<16x64xi32>
    %c7_i32_85 = arith.constant 7 : i32
    %160 = vector.broadcast %c7_i32_85 : i32 to vector<16x64xi32>
    %161 = arith.andi %155, %160 : vector<16x64xi32>
    %c7_i32_86 = arith.constant 7 : i32
    %162 = vector.broadcast %c7_i32_86 : i32 to vector<16x64xi32>
    %163 = arith.cmpi eq, %161, %162 : vector<16x64xi32>
    %cst_87 = arith.constant 0.000000e+00 : f32
    %164 = vector.broadcast %cst_87 : f32 to vector<1x64xf32>
    %165 = vector.extract_strided_slice %154 {offsets = [0, 0], sizes = [15, 64], strides = [1, 1]} : vector<16x64xf32> to vector<15x64xf32>
    %166 = tpu.concatenate %164, %165 in 0 : vector<1x64xf32>, vector<15x64xf32> -> vector<16x64xf32>
    %167 = vector.extract_strided_slice %154 {offsets = [1, 0], sizes = [15, 64], strides = [1, 1]} : vector<16x64xf32> to vector<15x64xf32>
    %168 = tpu.concatenate %167, %164 in 0 : vector<15x64xf32>, vector<1x64xf32> -> vector<16x64xf32>
    %cst_88 = arith.constant 0.000000e+00 : f32
    %169 = vector.broadcast %cst_88 : f32 to vector<16x64xf32>
    %170 = arith.select %159, %169, %166 : vector<16x64xi1>, vector<16x64xf32>
    %cst_89 = arith.constant 0.000000e+00 : f32
    %171 = vector.broadcast %cst_89 : f32 to vector<16x64xf32>
    %172 = arith.select %163, %171, %168 : vector<16x64xi1>, vector<16x64xf32>
    %cst_90 = arith.constant 1.000000e+00 : f32
    %173 = vector.broadcast %cst_90 : f32 to vector<16x1xf32>
    %174 = tpu.concatenate %170, %154, %172, %173 in 1 : vector<16x64xf32>, vector<16x64xf32>, vector<16x64xf32>, vector<16x1xf32> -> vector<16x193xf32>
    %c0_91 = arith.constant 0 : index
    %c0_92 = arith.constant 0 : index
    %175 = vector.load %arg8[%c0_91, %c0_92] : memref<193x64xf32, #tpu.memory_space<vmem>>, vector<193x64xf32>
    %cst_93 = arith.constant dense<0.000000e+00> : vector<16x64xf32>
    %176 = tpu.matmul %174, %175, %cst_93 {dimension_numbers = #tpu.dot_dimension_numbers<[1], [0], [0], [1], [0, 0, 1, 1], [], []>} : vector<16x193xf32>, vector<193x64xf32>, vector<16x64xf32> -> vector<16x64xf32>
    %177 = arith.addf %51, %176 : vector<16x64xf32>
    %178 = tpu.iota {dimensions = array<i32: 0>} : vector<16x64xi32>
    %c7_i32_94 = arith.constant 7 : i32
    %179 = vector.broadcast %c7_i32_94 : i32 to vector<16x64xi32>
    %180 = arith.andi %178, %179 : vector<16x64xi32>
    %c0_i32_95 = arith.constant 0 : i32
    %181 = vector.broadcast %c0_i32_95 : i32 to vector<16x64xi32>
    %182 = arith.cmpi eq, %180, %181 : vector<16x64xi32>
    %c7_i32_96 = arith.constant 7 : i32
    %183 = vector.broadcast %c7_i32_96 : i32 to vector<16x64xi32>
    %184 = arith.andi %178, %183 : vector<16x64xi32>
    %c7_i32_97 = arith.constant 7 : i32
    %185 = vector.broadcast %c7_i32_97 : i32 to vector<16x64xi32>
    %186 = arith.cmpi eq, %184, %185 : vector<16x64xi32>
    %cst_98 = arith.constant 0.000000e+00 : f32
    %187 = vector.broadcast %cst_98 : f32 to vector<1x64xf32>
    %188 = vector.extract_strided_slice %177 {offsets = [0, 0], sizes = [15, 64], strides = [1, 1]} : vector<16x64xf32> to vector<15x64xf32>
    %189 = tpu.concatenate %187, %188 in 0 : vector<1x64xf32>, vector<15x64xf32> -> vector<16x64xf32>
    %190 = vector.extract_strided_slice %177 {offsets = [1, 0], sizes = [15, 64], strides = [1, 1]} : vector<16x64xf32> to vector<15x64xf32>
    %191 = tpu.concatenate %190, %187 in 0 : vector<15x64xf32>, vector<1x64xf32> -> vector<16x64xf32>
    %cst_99 = arith.constant 0.000000e+00 : f32
    %192 = vector.broadcast %cst_99 : f32 to vector<16x64xf32>
    %193 = arith.select %182, %192, %189 : vector<16x64xi1>, vector<16x64xf32>
    %cst_100 = arith.constant 0.000000e+00 : f32
    %194 = vector.broadcast %cst_100 : f32 to vector<16x64xf32>
    %195 = arith.select %186, %194, %191 : vector<16x64xi1>, vector<16x64xf32>
    %cst_101 = arith.constant 1.000000e+00 : f32
    %196 = vector.broadcast %cst_101 : f32 to vector<16x1xf32>
    %197 = tpu.concatenate %193, %177, %195, %196 in 1 : vector<16x64xf32>, vector<16x64xf32>, vector<16x64xf32>, vector<16x1xf32> -> vector<16x193xf32>
    %c0_102 = arith.constant 0 : index
    %c0_103 = arith.constant 0 : index
    %198 = vector.load %arg9[%c0_102, %c0_103] : memref<193x128xf32, #tpu.memory_space<vmem>>, vector<193x128xf32>
    %cst_104 = arith.constant dense<0.000000e+00> : vector<16x128xf32>
    %199 = tpu.matmul %197, %198, %cst_104 {dimension_numbers = #tpu.dot_dimension_numbers<[1], [0], [0], [1], [0, 0, 1, 1], [], []>} : vector<16x193xf32>, vector<193x128xf32>, vector<16x128xf32> -> vector<16x128xf32>
    %200 = tpu.iota {dimensions = array<i32: 0>} : vector<8x64xi32>
    %c3_i32_105 = arith.constant 3 : i32
    %201 = vector.broadcast %c3_i32_105 : i32 to vector<8x64xi32>
    %202 = arith.andi %200, %201 : vector<8x64xi32>
    %c0_i32_106 = arith.constant 0 : i32
    %203 = vector.broadcast %c0_i32_106 : i32 to vector<8x64xi32>
    %204 = arith.cmpi eq, %202, %203 : vector<8x64xi32>
    %c3_i32_107 = arith.constant 3 : i32
    %205 = vector.broadcast %c3_i32_107 : i32 to vector<8x64xi32>
    %206 = arith.andi %200, %205 : vector<8x64xi32>
    %c3_i32_108 = arith.constant 3 : i32
    %207 = vector.broadcast %c3_i32_108 : i32 to vector<8x64xi32>
    %208 = arith.cmpi eq, %206, %207 : vector<8x64xi32>
    %cst_109 = arith.constant 0.000000e+00 : f32
    %209 = vector.broadcast %cst_109 : f32 to vector<1x64xf32>
    %210 = vector.extract_strided_slice %152 {offsets = [0, 0], sizes = [7, 64], strides = [1, 1]} : vector<8x64xf32> to vector<7x64xf32>
    %211 = tpu.concatenate %209, %210 in 0 : vector<1x64xf32>, vector<7x64xf32> -> vector<8x64xf32>
    %212 = vector.extract_strided_slice %152 {offsets = [1, 0], sizes = [7, 64], strides = [1, 1]} : vector<8x64xf32> to vector<7x64xf32>
    %213 = tpu.concatenate %212, %209 in 0 : vector<7x64xf32>, vector<1x64xf32> -> vector<8x64xf32>
    %cst_110 = arith.constant 0.000000e+00 : f32
    %214 = vector.broadcast %cst_110 : f32 to vector<8x64xf32>
    %215 = arith.select %204, %214, %211 : vector<8x64xi1>, vector<8x64xf32>
    %cst_111 = arith.constant 0.000000e+00 : f32
    %216 = vector.broadcast %cst_111 : f32 to vector<8x64xf32>
    %217 = arith.select %208, %216, %213 : vector<8x64xi1>, vector<8x64xf32>
    %cst_112 = arith.constant 1.000000e+00 : f32
    %218 = vector.broadcast %cst_112 : f32 to vector<8x1xf32>
    %219 = tpu.concatenate %215, %152, %217, %218 in 1 : vector<8x64xf32>, vector<8x64xf32>, vector<8x64xf32>, vector<8x1xf32> -> vector<8x193xf32>
    %c0_113 = arith.constant 0 : index
    %c0_114 = arith.constant 0 : index
    %220 = vector.load %arg10[%c0_113, %c0_114] : memref<193x128xf32, #tpu.memory_space<vmem>>, vector<193x128xf32>
    %cst_115 = arith.constant dense<0.000000e+00> : vector<8x128xf32>
    %221 = tpu.matmul %219, %220, %cst_115 {dimension_numbers = #tpu.dot_dimension_numbers<[1], [0], [0], [1], [0, 0, 1, 1], [], []>} : vector<8x193xf32>, vector<193x128xf32>, vector<8x128xf32> -> vector<8x128xf32>
    %222 = tpu.iota {dimensions = array<i32: 0>} : vector<4x32xi32>
    %c1_i32 = arith.constant 1 : i32
    %223 = vector.broadcast %c1_i32 : i32 to vector<4x32xi32>
    %224 = arith.andi %222, %223 : vector<4x32xi32>
    %c0_i32_116 = arith.constant 0 : i32
    %225 = vector.broadcast %c0_i32_116 : i32 to vector<4x32xi32>
    %226 = arith.cmpi eq, %224, %225 : vector<4x32xi32>
    %c1_i32_117 = arith.constant 1 : i32
    %227 = vector.broadcast %c1_i32_117 : i32 to vector<4x32xi32>
    %228 = arith.andi %222, %227 : vector<4x32xi32>
    %c1_i32_118 = arith.constant 1 : i32
    %229 = vector.broadcast %c1_i32_118 : i32 to vector<4x32xi32>
    %230 = arith.cmpi eq, %228, %229 : vector<4x32xi32>
    %cst_119 = arith.constant 0.000000e+00 : f32
    %231 = vector.broadcast %cst_119 : f32 to vector<1x32xf32>
    %232 = vector.extract_strided_slice %127 {offsets = [0, 0], sizes = [3, 32], strides = [1, 1]} : vector<4x32xf32> to vector<3x32xf32>
    %233 = tpu.concatenate %231, %232 in 0 : vector<1x32xf32>, vector<3x32xf32> -> vector<4x32xf32>
    %234 = vector.extract_strided_slice %127 {offsets = [1, 0], sizes = [3, 32], strides = [1, 1]} : vector<4x32xf32> to vector<3x32xf32>
    %235 = tpu.concatenate %234, %231 in 0 : vector<3x32xf32>, vector<1x32xf32> -> vector<4x32xf32>
    %cst_120 = arith.constant 0.000000e+00 : f32
    %236 = vector.broadcast %cst_120 : f32 to vector<4x32xf32>
    %237 = arith.select %226, %236, %233 : vector<4x32xi1>, vector<4x32xf32>
    %cst_121 = arith.constant 0.000000e+00 : f32
    %238 = vector.broadcast %cst_121 : f32 to vector<4x32xf32>
    %239 = arith.select %230, %238, %235 : vector<4x32xi1>, vector<4x32xf32>
    %cst_122 = arith.constant 1.000000e+00 : f32
    %240 = vector.broadcast %cst_122 : f32 to vector<4x1xf32>
    %241 = tpu.concatenate %237, %127, %239, %240 in 1 : vector<4x32xf32>, vector<4x32xf32>, vector<4x32xf32>, vector<4x1xf32> -> vector<4x97xf32>
    %c0_123 = arith.constant 0 : index
    %c0_124 = arith.constant 0 : index
    %242 = vector.load %arg11[%c0_123, %c0_124] : memref<97x128xf32, #tpu.memory_space<vmem>>, vector<97x128xf32>
    %cst_125 = arith.constant dense<0.000000e+00> : vector<4x128xf32>
    %243 = tpu.matmul %241, %242, %cst_125 {dimension_numbers = #tpu.dot_dimension_numbers<[1], [0], [0], [1], [0, 0, 1, 1], [], []>} : vector<4x97xf32>, vector<97x128xf32>, vector<4x128xf32> -> vector<4x128xf32>
    %244 = tpu.concatenate %199, %221, %243 in 0 : vector<16x128xf32>, vector<8x128xf32>, vector<4x128xf32> -> vector<28x128xf32>
    %c0_126 = arith.constant 0 : index
    %c0_127 = arith.constant 0 : index
    %c0_128 = arith.constant 0 : index
    %245 = vector.load %arg17[%c0_126, %c0_127, %c0_128] : memref<1x28x128xf32, #tpu.memory_space<vmem>>, vector<1x28x128xf32>
    %246 = vector.shape_cast %245 : vector<1x28x128xf32> to vector<28x128xf32>
    %247 = vector.shape_cast %244 : vector<28x128xf32> to vector<1x28x128xf32>
    tpu.vector_store %arg17[%c0_126, %c0_127, %c0_128], %247 {strides = array<i32>} : memref<1x28x128xf32, #tpu.memory_space<vmem>>, vector<1x28x128xf32>,
    return
  }
  func.func @transform_0(%arg0: i32) -> (i32, i32, i32) {
    %c0_i32 = arith.constant 0 : i32
    %c0_i32_0 = arith.constant 0 : i32
    %c0_i32_1 = arith.constant 0 : i32
    return %arg0, %c0_i32, %c0_i32_0 : i32, i32, i32
  }
  func.func @transform_1(%arg0: i32) -> (i32, i32) {
    %c0_i32 = arith.constant 0 : i32
    %c0_i32_0 = arith.constant 0 : i32
    %c0_i32_1 = arith.constant 0 : i32
    return %c0_i32, %c0_i32_0 : i32, i32
  }
  func.func @transform_2(%arg0: i32) -> (i32, i32) {
    %c0_i32 = arith.constant 0 : i32
    %c0_i32_0 = arith.constant 0 : i32
    %c0_i32_1 = arith.constant 0 : i32
    return %c0_i32, %c0_i32_0 : i32, i32
  }
  func.func @transform_3(%arg0: i32) -> (i32, i32) {
    %c0_i32 = arith.constant 0 : i32
    %c0_i32_0 = arith.constant 0 : i32
    %c0_i32_1 = arith.constant 0 : i32
    return %c0_i32, %c0_i32_0 : i32, i32
  }
  func.func @transform_4(%arg0: i32) -> (i32, i32) {
    %c0_i32 = arith.constant 0 : i32
    %c0_i32_0 = arith.constant 0 : i32
    %c0_i32_1 = arith.constant 0 : i32
    return %c0_i32, %c0_i32_0 : i32, i32
  }
  func.func @transform_5(%arg0: i32) -> (i32, i32) {
    %c0_i32 = arith.constant 0 : i32
    %c0_i32_0 = arith.constant 0 : i32
    %c0_i32_1 = arith.constant 0 : i32
    return %c0_i32, %c0_i32_0 : i32, i32
  }
  func.func @transform_6(%arg0: i32) -> (i32, i32) {
    %c0_i32 = arith.constant 0 : i32
    %c0_i32_0 = arith.constant 0 : i32
    %c0_i32_1 = arith.constant 0 : i32
    return %c0_i32, %c0_i32_0 : i32, i32
  }
  func.func @transform_7(%arg0: i32) -> (i32, i32) {
    %c0_i32 = arith.constant 0 : i32
    %c0_i32_0 = arith.constant 0 : i32
    %c0_i32_1 = arith.constant 0 : i32
    return %c0_i32, %c0_i32_0 : i32, i32
  }
  func.func @transform_8(%arg0: i32) -> (i32, i32) {
    %c0_i32 = arith.constant 0 : i32
    %c0_i32_0 = arith.constant 0 : i32
    %c0_i32_1 = arith.constant 0 : i32
    return %c0_i32, %c0_i32_0 : i32, i32
  }
  func.func @transform_9(%arg0: i32) -> (i32, i32) {
    %c0_i32 = arith.constant 0 : i32
    %c0_i32_0 = arith.constant 0 : i32
    %c0_i32_1 = arith.constant 0 : i32
    return %c0_i32, %c0_i32_0 : i32, i32
  }
  func.func @transform_10(%arg0: i32) -> (i32, i32) {
    %c0_i32 = arith.constant 0 : i32
    %c0_i32_0 = arith.constant 0 : i32
    %c0_i32_1 = arith.constant 0 : i32
    return %c0_i32, %c0_i32_0 : i32, i32
  }
  func.func @transform_11(%arg0: i32) -> (i32, i32) {
    %c0_i32 = arith.constant 0 : i32
    %c0_i32_0 = arith.constant 0 : i32
    %c0_i32_1 = arith.constant 0 : i32
    return %c0_i32, %c0_i32_0 : i32, i32
  }
  func.func @transform_12(%arg0: i32) -> (i32, i32) {
    %c0_i32 = arith.constant 0 : i32
    %c0_i32_0 = arith.constant 0 : i32
    %c0_i32_1 = arith.constant 0 : i32
    return %c0_i32, %c0_i32_0 : i32, i32
  }
  func.func @transform_13(%arg0: i32) -> (i32, i32) {
    %c0_i32 = arith.constant 0 : i32
    %c0_i32_0 = arith.constant 0 : i32
    %c0_i32_1 = arith.constant 0 : i32
    return %c0_i32, %c0_i32_0 : i32, i32
  }
  func.func @transform_14(%arg0: i32) -> (i32, i32) {
    %c0_i32 = arith.constant 0 : i32
    %c0_i32_0 = arith.constant 0 : i32
    %c0_i32_1 = arith.constant 0 : i32
    return %c0_i32, %c0_i32_0 : i32, i32
  }
  func.func @transform_15(%arg0: i32) -> (i32, i32) {
    %c0_i32 = arith.constant 0 : i32
    %c0_i32_0 = arith.constant 0 : i32
    %c0_i32_1 = arith.constant 0 : i32
    return %c0_i32, %c0_i32_0 : i32, i32
  }
  func.func @transform_16(%arg0: i32) -> (i32, i32, i32) {
    %c0_i32 = arith.constant 0 : i32
    %c0_i32_0 = arith.constant 0 : i32
    %c0_i32_1 = arith.constant 0 : i32
    return %arg0, %c0_i32, %c0_i32_0 : i32, i32, i32
  }
}

</mosaic_0001>

<bundles_post_ra>
// kernel: ssd_forward.1
= control target key start
LH: loop header
LB: loop body
LE: loop exit
PB: predicated region body
PF: predicated region fallthrough
CT: control target
= control target key end

     0   :  { %v2390_v3 = vmov 0.0   ;;  %vm78_vm0 = vcmask 1040384   ;;  %vm91_vm1 = vcmask 1046528   ;;  %vm124_vm2 = vcmask 523264   ;;  %s2391_s28 = smov 64   ;;  %s3879_s0 = inlined_call_operand.vmem [shape: f32[1,32,64], index: 0, kind: input, shape index: {}]   ;;  %s3880_s1 = inlined_call_operand.vmem [shape: f32[193,128], index: 1, kind: input, shape index: {}]   ;;  %s3881_s11 = inlined_call_operand.vmem [shape: f32[16,32], index: 11, kind: input, shape index: {}]   ;;  %s3882_s2 = inlined_call_operand.vmem [shape: f32[385,64], index: 2, kind: input, shape index: {}]   ;;  %s3883_s3 = inlined_call_operand.vmem [shape: f32[193,128], index: 3, kind: input, shape index: {}]   ;;  %s3884_s4 = inlined_call_operand.vmem [shape: f32[385,64], index: 4, kind: input, shape index: {}]   ;;  %s3885_s12 = inlined_call_operand.vmem [shape: f32[8,16], index: 12, kind: input, shape index: {}]   ;;  %s3886_s13 = inlined_call_operand.vmem [shape: f32[4,8], index: 13, kind: input, shape index: {}]   ;;  %s3887_s5 = inlined_call_operand.vmem [shape: f32[193,32], index: 5, kind: input, shape index: {}]   ;;  %s3888_s14 = inlined_call_operand.vmem [shape: f32[8,4], index: 14, kind: input, shape index: {}]   ;;  %s3889_s6 = inlined_call_operand.vmem [shape: f32[97,64], index: 6, kind: input, shape index: {}]   ;;  %s3890_s15 = inlined_call_operand.vmem [shape: f32[16,8], index: 15, kind: input, shape index: {}]   ;;  %s3891_s7 = inlined_call_operand.vmem [shape: f32[193,64], index: 7, kind: input, shape index: {}]   ;;  %s3892_s8 = inlined_call_operand.vmem [shape: f32[193,128], index: 8, kind: input, shape index: {}]   ;;  %s3893_s9 = inlined_call_operand.vmem [shape: f32[193,128], index: 9, kind: input, shape index: {}]   ;;  %s3894_s10 = inlined_call_operand.vmem [shape: f32[97,128], index: 10, kind: input, shape index: {}]   ;;  %s3895_s16 = inlined_call_operand.vmem [shape: f32[1,28,128], index: 16, kind: output, shape index: {}]  }
   0x1   :  { %3897 = sst [smem:[#allocation2_spill]] %s3879_s0  ;;  %174 = vmatprep.subr.mxu0 %v2390_v3  ;;  %372 = vmatprep.mubr.f32.mxu1 %v2390_v3  ;;  %v148_v9 = vld [vmem:[%s3880_s1 + $0x78] sm:$0xff]  ;;  %v147_v14 = vld [vmem:[%s3880_s1 + $0x70] sm:$0xff]  ;;  %vm158_vm3 = vcmask 531456   ;;  %v146_v17 = vld [vmem:[%s3880_s1 + $0x68] sm:$0xff]  ;;  %v57_v45 = vlaneseq  ;;  %vm301_vm10 = vcmask 261120  }
   0x2   :  { %s3898_s23 = sld [smem:[#allocation2_spill]]  ;;  %175 = vmatpush1.msra.mxu0 %v148_v9  ;;  %v145_v22 = vld [vmem:[%s3880_s1 + $0x60] sm:$0xff]  ;;  %v144_v24 = vld [vmem:[%s3880_s1 + $0x58] sm:$0xff]  ;;  %v143_v25 = vld [vmem:[%s3880_s1 + $0x50] sm:$0xff]  ;;  %vm511_vm13 = vcmask 7168  }
   0x3   :  { %176 = vmatprep.subr.mxu0 %v2390_v3  ;;  %v142_v26 = vld [vmem:[%s3880_s1 + $0x48] sm:$0xff]  ;;  %v141_v27 = vld [vmem:[%s3880_s1 + $0x40] sm:$0xff]  ;;  %v140_v28 = vld [vmem:[%s3880_s1 + $0x38] sm:$0xff]  ;;  %v2631_v46 = vshrl.u32 %v57_v45, 7 }
   0x4   :  { %177 = vmatpush1.msra.mxu0 %v147_v14  ;;  %v139_v29 = vld [vmem:[%s3880_s1 + $0x30] sm:$0xff]  ;;  %v138_v30 = vld [vmem:[%s3880_s1 + $0x28] sm:$0xff]  ;;  %v137_v31 = vld [vmem:[%s3880_s1 + $0x20] sm:$0xff] }
   0x5   :  { %178 = vmatprep.subr.mxu0 %v2390_v3  ;;  %v136_v32 = vld [vmem:[%s3880_s1 + $0x18] sm:$0xff]  ;;  %v135_v33 = vld [vmem:[%s3880_s1 + $0x10] sm:$0xff]  ;;  %v134_v34 = vld [vmem:[%s3880_s1 + $0x8] sm:$0xff]  ;;  %v2634_v47 = vadd.s32 8, %v2631_v46  ;;  %v62_v49 = vand.u32 15, %v2631_v46  ;;  %v60_v50 = vadd.s32 16, %v2631_v46 }
   0x6   :  { %179 = vmatpush1.msra.mxu0 %v146_v17  ;;  %v133_v35 = vld [vmem:[%s3880_s1] sm:$0xff]  ;;  %v156_v37 = vld [vmem:[%s3880_s1 + $0xb8] sm:$0xff]  ;;  %v155_v38 = vld [vmem:[%s3880_s1 + $0xb0] sm:$0xff]  ;;  %v61_v52 = vadd.s32 24, %v2631_v46 }
   0x7   :  { %180 = vmatprep.subr.mxu0 %v2390_v3  ;;  %v157_v36 = vld [vmem:[%s3880_s1 + $0xc0] sm:$0x1]  ;;  %v154_v39 = vld [vmem:[%s3880_s1 + $0xa8] sm:$0xff]  ;;  %v152_v41 = vld [vmem:[%s3880_s1 + $0x98] sm:$0xff]  ;;  %v63_v48 = vand.u32 15, %v2634_v47  ;;  %vm2644_vm5 = vcmp.eq.s32.totalorder %v62_v49, 0 }
   0x8   :  { %v2483_v0 = vld [vmem:[%s3898_s23] sm:$0xff]  ;;  %v54_v1 = vld [vmem:[%s3898_s23 + $0x8] sm:$0xff]  ;;  %v55_v2 = vld [vmem:[%s3898_s23 + $0x10] sm:$0xff]  ;;  %181 = vmatpush1.msra.mxu0 %v145_v22  ;;  %v64_v56 = vand.u32 15, %v60_v50  ;;  %v65_v58 = vand.u32 15, %v61_v52 }
   0x9   :  { %112 = vrot.lane.b32.xlu0 %v2483_v0, %s2391_s28  ;;  %v79_v4 = vrot.slane %v2483_v0, 7  ;;  %v92_v5 = vrot.slane %v2483_v0, 1  ;;  %v80_v6 = vrot.slane %v54_v1, 7  ;;  %v93_v7 = vrot.slane %v54_v1, 1  ;;  %116 = vrot.lane.b32.xlu1 %v55_v2, %s2391_s28  ;;  %v2501_v8 = vld [vmem:[%s3898_s23 + $0x18] sm:$0xff]  ;;  %v153_v40 = vld [vmem:[%s3880_s1 + $0xa0] sm:$0xff]  ;;  %vm2164_vm9 = vmneg %vm2644_vm5 }
   0xa   :  { %v82_v10 = vrot.slane %v55_v2, 7  ;;  %v95_v11 = vrot.slane %v55_v2, 1  ;;  %v84_v12 = vrot.slane %v2501_v8, 7  ;;  %v97_v13 = vrot.slane %v2501_v8, 1  ;;  %182 = vmatprep.subr.mxu0 %v2390_v3  ;;  %v151_v42 = vld [vmem:[%s3880_s1 + $0x90] sm:$0xff]  ;;  %v150_v43 = vld [vmem:[%s3880_s1 + $0x88] sm:$0xff] }
   0xb   :  { %v94_v15 = vsel %vm91_vm1, %v92_v5, %v93_v7  ;;  %v2516_v16 = vsel %vm78_vm0, %v79_v4, %v80_v6  ;;  %183 = vmatpush1.msra.mxu0 %v144_v24  ;;  %v149_v44 = vld [vmem:[%s3880_s1 + $0x80] sm:$0xff]  ;;  %vm2639_vm4 = vcmp.eq.s32.totalorder %v63_v48, 15  ;;  %v90_v54 = vsel %vm78_vm0, 0.0, %v79_v4  ;;  %v492_v45 = vld [vmem:[%s3882_s2 + $0xf0] sm:$0xff]  ;;  %v491_v49 = vld [vmem:[%s3882_s2 + $0xe8] sm:$0xff] }
   0xc   :  { %v129_v18 = vsel %vm124_vm2, %v94_v15, 1.0  ;;  %v2523_v19 = vsel %vm91_vm1, %v93_v7, %v95_v11  ;;  %v2528_v20 = vsel %vm91_vm1, %v95_v11, %v97_v13  ;;  %v2531_v21 = vsel %vm78_vm0, %v80_v6, %v82_v10  ;;  %184 = vmatprep.subr.mxu0 %v2390_v3  ;;  %vm2170_vm12 = vmneg %vm2639_vm4  ;;  %v476_v48 = vld [vmem:[%s3882_s2 + $0x70] sm:$0xff]  ;;  %v475_v50 = vld [vmem:[%s3882_s2 + $0x68] sm:$0xff] }
   0xd   :  { %114 = vrot.lane.b32.xlu0 %v54_v1, %s2391_s28  ;;  %118 = vrot.lane.b32.xlu1 %v2501_v8, %s2391_s28  ;;  %v2542_v23 = vsel %vm78_vm0, %v82_v10, %v84_v12  ;;  %v109_v55 = vsel %vm2639_vm4, 0.0, %v2523_v19  ;;  %v104_v57 = vsel %vm2644_vm5, 0.0, %v90_v54  ;;  %vm2658_vm6 = vcmp.eq.s32.totalorder %v64_v56, 0  ;;  %v490_v51 = vld [vmem:[%s3882_s2 + $0xe0] sm:$0xff]  ;;  %v489_v53 = vld [vmem:[%s3882_s2 + $0xd8] sm:$0xff] }
   0xe   :  { %2158 = vmatprep.mubr.msk.f32.mxu0 %vm158_vm3, %v129_v18  ;;  %185 = vmatpush1.msra.mxu0 %v143_v25  ;;  %v130_v60 = vsel %vm124_vm2, %v109_v55, 1.0  ;;  %vm2662_vm7 = vcmp.eq.s32.totalorder %v65_v58, 15  ;;  %v103_v1 = vsel %vm91_vm1, %v97_v13, 0.0  ;;  %v131_v4 = vsel %vm124_vm2, %v2528_v20, 1.0  ;;  %vm2162_vm8 = vmneg %vm2658_vm6  ;;  %v474_v52 = vld [vmem:[%s3882_s2 + $0x60] sm:$0xff]  ;;  %v473_v54 = vld [vmem:[%s3882_s2 + $0x58] sm:$0xff] }
   0xf   :  { %186 = vmatprep.subr.mxu0 %v2390_v3  ;;  %v106_v5 = vsel %vm2658_vm6, 0.0, %v2531_v21  ;;  %v111_v7 = vsel %vm2662_vm7, 0.0, %v103_v1  ;;  %vm2168_vm11 = vmneg %vm2662_vm7  ;;  %v488_v55 = vld [vmem:[%s3882_s2 + $0xd0] sm:$0xff]  ;;  %v471_v58 = vld [vmem:[%s3882_s2 + $0x48] sm:$0xff] }
  0x10   :  { %187 = vmatpush1.msra.mxu0 %v142_v26  ;;  %v132_v10 = vsel %vm124_vm2, %v111_v7, 1.0  ;;  %v472_v56 = vld [vmem:[%s3882_s2 + $0x50] sm:$0xff]  ;;  %v469_v62 = vld [vmem:[%s3882_s2 + $0x38] sm:$0xff]  ;;  %v483_v1 = vld [vmem:[%s3882_s2 + $0xa8] sm:$0xff] }
  0x11   :  { %188 = vmatprep.subr.mxu0 %v2390_v3  ;;  %v468_v0 = vld [vmem:[%s3882_s2 + $0x30] sm:$0xff]  ;;  %v465_v7 = vld [vmem:[%s3882_s2 + $0x18] sm:$0xff] }
  0x12   :  { %189 = vmatpush1.msra.mxu0 %v141_v27 }
  0x13   :  { %190 = vmatprep.subr.mxu0 %v2390_v3 }
  0x14   :  { %191 = vmatpush1.msra.mxu0 %v140_v28 }
  0x15   :  { %192 = vmatprep.subr.mxu0 %v2390_v3 }
  0x16   :  { %193 = vmatpush1.msra.mxu0 %v139_v29 }
  0x17   :  { %194 = vmatprep.subr.mxu0 %v2390_v3 }
  0x18   :  { %195 = vmatpush1.msra.mxu0 %v138_v30 }
  0x19   :  { %196 = vmatprep.subr.mxu0 %v2390_v3 }
  0x1a   :  { %197 = vmatpush1.msra.mxu0 %v137_v31 }
  0x1b   :  { %198 = vmatprep.subr.mxu0 %v2390_v3 }
  0x1c   :  { %199 = vmatpush1.msra.mxu0 %v136_v32  ;;  %v299_v32 = vld [vmem:[%s3881_s11] sm:$0xff] }
  0x1d   :  { %200 = vmatprep.subr.mxu0 %v2390_v3 }
  0x1e   :  { %201 = vmatpush1.msra.mxu0 %v135_v33 }
  0x1f   :  { %202 = vmatprep.subr.mxu0 %v2390_v3 }
  0x20   :  { %203 = vmatpush1.msra.mxu0 %v134_v34 }
  0x21   :  { %204 = vmatprep.subr.mxu0 %v2390_v3 }
  0x22   :  { %205 = vmatpush1.msra.mxu0 %v133_v35  ;;  %v2392_v35 = vmov 1.0  }
  0x23   :  { %220 = vmatprep.subr.mxu0 %v2390_v3 }
  0x24   :  { %2157 = vmatpush2.msk.msra.mxu0 %vm78_vm0, %v157_v36 }
  0x25   :  { %222 = vmatprep.subr.mxu0 %v2390_v3 }
  0x26   :  { %223 = vmatpush2.msra.mxu0 %v156_v37  ;;  %v300_v37 = vld [vmem:[%s3881_s11 + $0x8] sm:$0xff]  ;;  %s2394_s11 = smov 32  }
  0x27   :  { %224 = vmatprep.subr.mxu0 %v2390_v3 }
  0x28   :  { %225 = vmatpush2.msra.mxu0 %v155_v38 }
  0x29   :  { %226 = vmatprep.subr.mxu0 %v2390_v3 }
  0x2a   :  { %227 = vmatpush2.msra.mxu0 %v154_v39 }
  0x2b   :  { %228 = vmatprep.subr.mxu0 %v2390_v3 }
  0x2c   :  { %229 = vmatpush2.msra.mxu0 %v153_v40 }
  0x2d   :  { %230 = vmatprep.subr.mxu0 %v2390_v3 }
  0x2e   :  { %231 = vmatpush2.msra.mxu0 %v152_v41 }
  0x2f   :  { %232 = vmatprep.subr.mxu0 %v2390_v3 }
  0x30   :  { %233 = vmatpush2.msra.mxu0 %v151_v42  ;;  %v493_v42 = vld [vmem:[%s3882_s2 + $0xf8] sm:$0xff] }
  0x31   :  { %234 = vmatprep.subr.mxu0 %v2390_v3 }
  0x32   :  { %235 = vmatpush2.msra.mxu0 %v150_v43 }
  0x33   :  { %236 = vmatprep.subr.mxu0 %v2390_v3 }
  0x34   :  { %237 = vmatpush2.msra.mxu0 %v149_v44  ;;  %v477_v44 = vld [vmem:[%s3882_s2 + $0x78] sm:$0xff] }
  0x35   :  { %741 = vmatprep.subr.mxu0 %v2390_v3 }
  0x7b   :  { %v113_v59 = vpop.permute.xlu0 %112  ;;  %v117_v63 = vpop.permute.xlu1 %116 }
  0x7c   :  { %v125_v61 = vsel %vm124_vm2, %v104_v57, %v113_v59  ;;  %v127_v8 = vsel %vm124_vm2, %v106_v5, %v117_v63  ;;  %v487_v57 = vld [vmem:[%s3882_s2 + $0xc8] sm:$0xff]  ;;  %v486_v59 = vld [vmem:[%s3882_s2 + $0xc0] sm:$0xff]  ;;  %v484_v63 = vld [vmem:[%s3882_s2 + $0xb0] sm:$0xff] }
  0x7d   :  { %239 = vmatmul.mubr.f32.vlgmr.msra.gmra.mxu0 %v125_v61  ;;  %v485_v61 = vld [vmem:[%s3882_s2 + $0xb8] sm:$0xff]  ;;  %v466_v5 = vld [vmem:[%s3882_s2 + $0x20] sm:$0xff] }
  0x7e   :  { %2159 = vmatprep.mubr.msk.f32.mxu0 %vm158_vm3, %v130_v60  ;;  %v470_v60 = vld [vmem:[%s3882_s2 + $0x40] sm:$0xff] }
  0x7f   :  { %v115_v2 = vpop.permute.xlu0 %114  ;;  %v119_v9 = vpop.permute.xlu1 %118 }
  0x80   :  { %v126_v6 = vsel %vm124_vm2, %v2516_v16, %v115_v2  ;;  %v128_v11 = vsel %vm124_vm2, %v2542_v23, %v119_v9  ;;  %v467_v2 = vld [vmem:[%s3882_s2 + $0x28] sm:$0xff]  ;;  %v464_v9 = vld [vmem:[%s3882_s2 + $0x10] sm:$0xff] }
  0x81   :  { %244 = vmatmul.mubr.f32.gmra.mxu0 %v126_v6  ;;  %v481_v6 = vld [vmem:[%s3882_s2 + $0x98] sm:$0xff] }
  0x82   :  { %2160 = vmatprep.mubr.msk.f32.mxu0 %vm158_vm3, %v131_v4  ;;  %v482_v4 = vld [vmem:[%s3882_s2 + $0xa0] sm:$0xff] }
  0x85   :  { %249 = vmatmul.mubr.f32.gmra.mxu0 %v127_v8  ;;  %v480_v8 = vld [vmem:[%s3882_s2 + $0x90] sm:$0xff] }
  0x86   :  { %2161 = vmatprep.mubr.msk.f32.mxu0 %vm158_vm3, %v132_v10  ;;  %v479_v10 = vld [vmem:[%s3882_s2 + $0x88] sm:$0xff] }
  0x89   :  { %254 = vmatmul.mubr.f32.gmra.mxu0 %v128_v11  ;;  %v463_v11 = vld [vmem:[%s3882_s2 + $0x8] sm:$0xff] }
 0x13d   :  { %v240_v12 = vpop.f32.mrf.mxu0 }
 0x13e   :  { %v259_v24 = vmax.f32 %v240_v12, 0.0  ;;  %v478_v12 = vld [vmem:[%s3882_s2 + $0x80] sm:$0xff] }
 0x13f   :  { %v242_v13 = vpop.f32.mrf.mxu0 }
 0x140   :  { %v267_v23 = vrot.slane %v259_v24, 7  ;;  %v279_v40 = vrot.slane %v259_v24, 1  ;;  %v462_v13 = vld [vmem:[%s3882_s2] sm:$0xff] }
 0x141   :  { %v245_v14 = vpop.f32.mrf.mxu0 }
 0x142   :  { %v260_v20 = vmax.f32 %v245_v14, 0.0  ;;  %v278_v33 = vsel %vm78_vm0, 0.0, %v267_v23 }
 0x143   :  { %v247_v15 = vpop.f32.mrf.mxu0 }
 0x144   :  { %v268_v27 = vrot.slane %v260_v20, 7  ;;  %v280_v38 = vrot.slane %v260_v20, 1 }
 0x145   :  { %v250_v16 = vpop.f32.mrf.mxu0 }
 0x146   :  { %v261_v18 = vmax.f32 %v250_v16, 0.0  ;;  %v269_v31 = vsel %vm78_vm0, %v267_v23, %v268_v27  ;;  %v281_v43 = vsel %vm91_vm1, %v279_v40, %v280_v38  ;;  %v509_v16 = vld [vmem:[%s3882_s2 + $0x178] sm:$0xff] }
 0x147   :  { %v252_v17 = vpop.f32.mrf.mxu0  ;;  %v501_v23 = vld [vmem:[%s3882_s2 + $0x138] sm:$0xff] }
 0x148   :  { %v270_v25 = vrot.slane %v261_v18, 7  ;;  %v282_v34 = vrot.slane %v261_v18, 1  ;;  %v508_v17 = vld [vmem:[%s3882_s2 + $0x170] sm:$0xff]  ;;  %v722_v40 = vld [vmem:[%s3883_s3 + $0x78] sm:$0xff] }
 0x149   :  { %v255_v19 = vpop.f32.mrf.mxu0  ;;  %742 = vmatpush1.msra.mxu0 %v722_v40 }
 0x14a   :  { %v262_v21 = vmax.f32 %v255_v19, 0.0  ;;  %v271_v29 = vsel %vm78_vm0, %v268_v27, %v270_v25  ;;  %v283_v41 = vsel %vm91_vm1, %v280_v38, %v282_v34  ;;  %v507_v19 = vld [vmem:[%s3882_s2 + $0x168] sm:$0xff]  ;;  %v510_v38 = vld [vmem:[%s3882_s2 + $0x180] sm:$0x1]  ;;  %743 = vmatprep.subr.mxu0 %v2390_v3 }
 0x14b   :  { %v257_v22 = vpop.f32.mrf.mxu0  ;;  %v503_v27 = vld [vmem:[%s3882_s2 + $0x148] sm:$0xff] }
 0x14c   :  { %332 = vmatprep.subr.mxu1 %v262_v21  ;;  %v272_v26 = vrot.slane %v262_v21, 7  ;;  %v284_v30 = vrot.slane %v262_v21, 1  ;;  %v506_v21 = vld [vmem:[%s3882_s2 + $0x160] sm:$0xff] }
 0x14e   :  { %v273_v28 = vsel %vm78_vm0, %v270_v25, %v272_v26  ;;  %v290_v36 = vsel %vm91_vm1, %v284_v30, 0.0  ;;  %v285_v39 = vsel %vm91_vm1, %v282_v34, %v284_v30  ;;  %v504_v26 = vld [vmem:[%s3882_s2 + $0x150] sm:$0xff]  ;;  %v499_v30 = vld [vmem:[%s3882_s2 + $0x128] sm:$0xff] }
 0x14f   :  { %333 = vmatpush1.msra.mxu1 %v273_v28  ;;  %v502_v28 = vld [vmem:[%s3882_s2 + $0x140] sm:$0xff]  ;;  %v495_v34 = vld [vmem:[%s3882_s2 + $0x108] sm:$0xff] }
 0x150   :  { %334 = vmatprep.subr.mxu1 %v261_v18 }
 0x151   :  { %2163 = vmatpush1.msk.msra.mxu1 %vm2162_vm8, %v271_v29  ;;  %v500_v29 = vld [vmem:[%s3882_s2 + $0x130] sm:$0xff]  ;;  %vm837_vm8 = vcmask 130048  }
 0x152   :  { %336 = vmatprep.subr.mxu1 %v260_v20 }
 0x153   :  { %337 = vmatpush1.msra.mxu1 %v269_v31  ;;  %v498_v31 = vld [vmem:[%s3882_s2 + $0x120] sm:$0xff] }
 0x154   :  { %338 = vmatprep.subr.mxu1 %v259_v24  ;;  %v505_v24 = vld [vmem:[%s3882_s2 + $0x158] sm:$0xff] }
 0x155   :  { %2165 = vmatpush1.msk.msra.mxu1 %vm2164_vm9, %v278_v33  ;;  %v496_v33 = vld [vmem:[%s3882_s2 + $0x110] sm:$0xff] }
 0x156   :  { %2166 = vmatmul.mubr.msk.f32.vlgmr.msra.gmra.mxu1 %vm301_vm10, %v299_v32  ;;  %409 = vmatprep.subr.mxu1 %v2392_v35 }
 0x157   :  { %2169 = vmatpush1.msk.msra.mxu1 %vm2168_vm11, %v290_v36  ;;  %378 = vmatprep.mubr.f32.mxu1 %v2390_v3  ;;  %v494_v36 = vld [vmem:[%s3882_s2 + $0x100] sm:$0xff] }
 0x158   :  { %411 = vmatprep.subr.mxu1 %v2392_v35 }
 0x159   :  { %412 = vmatpush1.msra.mxu1 %v285_v39 }
 0x15a   :  { %413 = vmatprep.subr.mxu1 %v2392_v35  ;;  %2167 = vmatmul.mubr.msk.f32.gmra.mxu1 %vm301_vm10, %v300_v37 }
 0x15b   :  { %2171 = vmatpush1.msk.msra.mxu1 %vm2170_vm12, %v283_v41  ;;  %449 = vmatprep.mubr.f32.mxu1 %v2390_v3  ;;  %v721_v41 = vld [vmem:[%s3883_s3 + $0x70] sm:$0xff] }
 0x15c   :  { %415 = vmatprep.subr.mxu1 %v2392_v35  ;;  %744 = vmatpush1.msra.mxu0 %v721_v41 }
 0x15d   :  { %416 = vmatpush1.msra.mxu1 %v281_v43  ;;  %745 = vmatprep.subr.mxu0 %v2390_v3  ;;  %v719_v43 = vld [vmem:[%s3883_s3 + $0x60] sm:$0xff] }
 0x15e   :  { %2172 = vmatmul.mubr.msk.f32.vlgmr.msra.gmra.mxu1 %vm301_vm10, %v299_v32  ;;  %2211 = vmatprep.subr.mxu1 %v493_v42  ;;  %v497_v32 = vld [vmem:[%s3882_s2 + $0x118] sm:$0xff]  ;;  %v720_v42 = vld [vmem:[%s3883_s3 + $0x68] sm:$0xff] }
 0x15f   :  { %455 = vmatprep.mubr.f32.mxu1 %v2390_v3  ;;  %2212 = vmatpush3.msra.mxu1 %v477_v44  ;;  %v718_v44 = vld [vmem:[%s3883_s3 + $0x58] sm:$0xff] }
 0x160   :  { %2213 = vmatprep.subr.mxu1 %v492_v45  ;;  %746 = vmatpush1.msra.mxu0 %v720_v42  ;;  %v717_v45 = vld [vmem:[%s3883_s3 + $0x50] sm:$0xff]  ;;  %v1030_v42 = vld [vmem:[%s3884_s4 + $0x178] sm:$0xff] }
 0x161   :  { %2214 = vmatpush3.msra.mxu1 %v476_v48  ;;  %747 = vmatprep.subr.mxu0 %v2390_v3  ;;  %v716_v48 = vld [vmem:[%s3883_s3 + $0x48] sm:$0xff] }
 0x162   :  { %2173 = vmatmul.mubr.msk.f32.gmra.mxu1 %vm301_vm10, %v300_v37  ;;  %2215 = vmatprep.subr.mxu1 %v491_v49  ;;  %v715_v49 = vld [vmem:[%s3883_s3 + $0x40] sm:$0xff] }
 0x163   :  { %2216 = vmatpush3.msra.mxu1 %v475_v50  ;;  %748 = vmatpush1.msra.mxu0 %v719_v43  ;;  %v714_v50 = vld [vmem:[%s3883_s3 + $0x38] sm:$0xff]  ;;  %v1029_v43 = vld [vmem:[%s3884_s4 + $0x170] sm:$0xff] }
 0x164   :  { %2217 = vmatprep.subr.mxu1 %v490_v51  ;;  %749 = vmatprep.subr.mxu0 %v2390_v3  ;;  %v713_v51 = vld [vmem:[%s3883_s3 + $0x30] sm:$0xff] }
 0x165   :  { %2218 = vmatpush3.msra.mxu1 %v474_v52  ;;  %750 = vmatpush1.msra.mxu0 %v718_v44  ;;  %v712_v52 = vld [vmem:[%s3883_s3 + $0x28] sm:$0xff] }
 0x166   :  { %2219 = vmatprep.subr.mxu1 %v489_v53  ;;  %751 = vmatprep.subr.mxu0 %v2390_v3  ;;  %v711_v53 = vld [vmem:[%s3883_s3 + $0x20] sm:$0xff]  ;;  %v1028_v44 = vld [vmem:[%s3884_s4 + $0x168] sm:$0xff] }
 0x167   :  { %2220 = vmatpush3.msra.mxu1 %v473_v54  ;;  %752 = vmatpush1.msra.mxu0 %v717_v45  ;;  %v710_v54 = vld [vmem:[%s3883_s3 + $0x18] sm:$0xff]  ;;  %v1027_v45 = vld [vmem:[%s3884_s4 + $0x160] sm:$0xff] }
 0x168   :  { %2221 = vmatprep.subr.mxu1 %v488_v55  ;;  %753 = vmatprep.subr.mxu0 %v2390_v3  ;;  %v709_v55 = vld [vmem:[%s3883_s3 + $0x10] sm:$0xff] }
 0x169   :  { %2222 = vmatpush3.msra.mxu1 %v472_v56  ;;  %754 = vmatpush1.msra.mxu0 %v716_v48  ;;  %v708_v56 = vld [vmem:[%s3883_s3 + $0x8] sm:$0xff]  ;;  %v1026_v48 = vld [vmem:[%s3884_s4 + $0x158] sm:$0xff] }
 0x16a   :  { %2223 = vmatprep.subr.mxu1 %v487_v57  ;;  %755 = vmatprep.subr.mxu0 %v2390_v3  ;;  %v707_v57 = vld [vmem:[%s3883_s3] sm:$0xff] }
 0x16b   :  { %2224 = vmatpush3.msra.mxu1 %v471_v58  ;;  %756 = vmatpush1.msra.mxu0 %v715_v49  ;;  %v731_v58 = vld [vmem:[%s3883_s3 + $0xc0] sm:$0x1]  ;;  %v1025_v49 = vld [vmem:[%s3884_s4 + $0x150] sm:$0xff] }
 0x16c   :  { %2225 = vmatprep.subr.mxu1 %v486_v59  ;;  %757 = vmatprep.subr.mxu0 %v2390_v3  ;;  %v730_v59 = vld [vmem:[%s3883_s3 + $0xb8] sm:$0xff] }
 0x16d   :  { %2226 = vmatpush3.msra.mxu1 %v470_v60  ;;  %758 = vmatpush1.msra.mxu0 %v714_v50  ;;  %v729_v60 = vld [vmem:[%s3883_s3 + $0xb0] sm:$0xff]  ;;  %v1024_v50 = vld [vmem:[%s3884_s4 + $0x148] sm:$0xff] }
 0x16e   :  { %2227 = vmatprep.subr.mxu1 %v485_v61  ;;  %759 = vmatprep.subr.mxu0 %v2390_v3  ;;  %v728_v61 = vld [vmem:[%s3883_s3 + $0xa8] sm:$0xff] }
 0x16f   :  { %2228 = vmatpush3.msra.mxu1 %v469_v62  ;;  %760 = vmatpush1.msra.mxu0 %v713_v51  ;;  %v727_v62 = vld [vmem:[%s3883_s3 + $0xa0] sm:$0xff] }
 0x170   :  { %2229 = vmatprep.subr.mxu1 %v484_v63  ;;  %761 = vmatprep.subr.mxu0 %v2390_v3  ;;  %v726_v63 = vld [vmem:[%s3883_s3 + $0x98] sm:$0xff]  ;;  %v1023_v51 = vld [vmem:[%s3884_s4 + $0x140] sm:$0xff] }
 0x171   :  { %2230 = vmatpush3.msra.mxu1 %v468_v0  ;;  %762 = vmatpush1.msra.mxu0 %v712_v52  ;;  %v725_v0 = vld [vmem:[%s3883_s3 + $0x90] sm:$0xff]  ;;  %v1022_v52 = vld [vmem:[%s3884_s4 + $0x138] sm:$0xff] }
 0x172   :  { %2231 = vmatprep.subr.mxu1 %v483_v1  ;;  %763 = vmatprep.subr.mxu0 %v2390_v3  ;;  %v724_v1 = vld [vmem:[%s3883_s3 + $0x88] sm:$0xff] }
 0x173   :  { %2232 = vmatpush3.msra.mxu1 %v467_v2  ;;  %764 = vmatpush1.msra.mxu0 %v711_v53  ;;  %v1021_v53 = vld [vmem:[%s3884_s4 + $0x130] sm:$0xff] }
 0x174   :  { %2233 = vmatprep.subr.mxu1 %v482_v4  ;;  %765 = vmatprep.subr.mxu0 %v2390_v3  ;;  %v723_v4 = vld [vmem:[%s3883_s3 + $0x80] sm:$0xff] }
 0x175   :  { %2234 = vmatpush3.msra.mxu1 %v466_v5  ;;  %766 = vmatpush1.msra.mxu0 %v710_v54  ;;  %v1020_v54 = vld [vmem:[%s3884_s4 + $0x128] sm:$0xff] }
 0x176   :  { %2235 = vmatprep.subr.mxu1 %v481_v6  ;;  %767 = vmatprep.subr.mxu0 %v2390_v3 }
 0x177   :  { %2236 = vmatpush3.msra.mxu1 %v465_v7  ;;  %768 = vmatpush1.msra.mxu0 %v709_v55  ;;  %v1019_v55 = vld [vmem:[%s3884_s4 + $0x120] sm:$0xff] }
 0x178   :  { %2237 = vmatprep.subr.mxu1 %v480_v8  ;;  %769 = vmatprep.subr.mxu0 %v2390_v3 }
 0x179   :  { %2238 = vmatpush3.msra.mxu1 %v464_v9  ;;  %770 = vmatpush1.msra.mxu0 %v708_v56  ;;  %v1018_v56 = vld [vmem:[%s3884_s4 + $0x118] sm:$0xff] }
 0x17a   :  { %2239 = vmatprep.subr.mxu1 %v479_v10  ;;  %771 = vmatprep.subr.mxu0 %v2390_v3 }
 0x17b   :  { %2240 = vmatpush3.msra.mxu1 %v463_v11  ;;  %772 = vmatpush1.msra.mxu0 %v707_v57 }
 0x17c   :  { %2241 = vmatprep.subr.mxu1 %v478_v12  ;;  %787 = vmatprep.subr.mxu0 %v2390_v3 }
 0x17d   :  { %2242 = vmatpush3.msra.mxu1 %v462_v13  ;;  %2177 = vmatpush2.msk.msra.mxu0 %vm78_vm0, %v731_v58 }
 0x17e   :  { %596 = vmatprep.subr.mxu1 %v2390_v3  ;;  %789 = vmatprep.subr.mxu0 %v2390_v3 }
 0x17f   :  { %790 = vmatpush2.msra.mxu0 %v730_v59 }
 0x180   :  { %791 = vmatprep.subr.mxu0 %v2390_v3 }
 0x181   :  { %792 = vmatpush2.msra.mxu0 %v729_v60 }
 0x182   :  { %793 = vmatprep.subr.mxu0 %v2390_v3 }
 0x183   :  { %794 = vmatpush2.msra.mxu0 %v728_v61 }
 0x184   :  { %795 = vmatprep.subr.mxu0 %v2390_v3 }
 0x185   :  { %796 = vmatpush2.msra.mxu0 %v727_v62 }
 0x186   :  { %797 = vmatprep.subr.mxu0 %v2390_v3 }
 0x187   :  { %798 = vmatpush2.msra.mxu0 %v726_v63 }
 0x188   :  { %799 = vmatprep.subr.mxu0 %v2390_v3 }
 0x189   :  { %800 = vmatpush2.msra.mxu0 %v725_v0 }
 0x18a   :  { %801 = vmatprep.subr.mxu0 %v2390_v3 }
 0x18b   :  { %802 = vmatpush2.msra.mxu0 %v724_v1 }
 0x18c   :  { %803 = vmatprep.subr.mxu0 %v2390_v3 }
 0x18d   :  { %804 = vmatpush2.msra.mxu0 %v723_v4  ;;  %v836_v4 = vld [vmem:[%s3885_s12] sm:$0xff] }
 0x18e   :  { %1108 = vmatprep.subr.mxu0 %v2390_v3 }
 0x216   :  { %v374_v14 = vpop.f32.mrf.mxu1 }
 0x218   :  { %v376_v15 = vpop.f32.mrf.mxu1 }
 0x219   :  { %585 = vmatprep.mubr.f32.mxu1 %v376_v15 }
 0x21a   :  { %586 = vmatmul.mubr.f32.vlgmr.msra.gmra.mxu1 %v374_v14  ;;  %v380_v18 = vpop.f32.mrf.mxu1 }
 0x21b   :  { %597 = vmatpush1.msra.mxu1 %v509_v16 }
 0x21c   :  { %598 = vmatprep.subr.mxu1 %v2390_v3  ;;  %v382_v20 = vpop.f32.mrf.mxu1 }
 0x21d   :  { %599 = vmatpush1.msra.mxu1 %v508_v17  ;;  %590 = vmatprep.mubr.f32.mxu1 %v382_v20 }
 0x21e   :  { %600 = vmatprep.subr.mxu1 %v2390_v3  ;;  %591 = vmatmul.mubr.f32.gmra.mxu1 %v380_v18  ;;  %v451_v22 = vpop.f32.mrf.mxu1  ;;  %v673_v18 = vand.u32 7, %v2631_v46 }
 0x21f   :  { %601 = vmatpush1.msra.mxu1 %v507_v19 }
 0x220   :  { %602 = vmatprep.subr.mxu1 %v2390_v3  ;;  %v453_v25 = vpop.f32.mrf.mxu1  ;;  %vm2998_vm14 = vcmp.eq.s32.totalorder %v673_v18, 7  ;;  %vm3015_vm4 = vcmp.eq.s32.totalorder %v673_v18, 0  ;;  %v1010_v18 = vld [vmem:[%s3884_s4 + $0xd8] sm:$0xff] }
 0x221   :  { %603 = vmatpush1.msra.mxu1 %v506_v21  ;;  %2175 = vmatprep.mubr.msk.f32.mxu1 %vm511_vm13, %v453_v25  ;;  %vm2182_vm7 = vmneg %vm3015_vm4 }
 0x222   :  { %604 = vmatprep.subr.mxu1 %v2390_v3  ;;  %v457_v37 = vpop.f32.mrf.mxu1  ;;  %vm2187_vm11 = vmneg %vm2998_vm14 }
 0x223   :  { %605 = vmatpush1.msra.mxu1 %v505_v24 }
 0x224   :  { %606 = vmatprep.subr.mxu1 %v2390_v3  ;;  %v459_v39 = vpop.f32.mrf.mxu1 }
 0x225   :  { %607 = vmatpush1.msra.mxu1 %v504_v26  ;;  %v674_v26 = vand.u32 7, %v2634_v47 }
 0x226   :  { %608 = vmatprep.subr.mxu1 %v2390_v3 }
 0x227   :  { %609 = vmatpush1.msra.mxu1 %v503_v27  ;;  %vm3009_vm15 = vcmp.eq.s32.totalorder %v674_v26, 7  ;;  %vm3025_vm5 = vcmp.eq.s32.totalorder %v674_v26, 0  ;;  %v1007_v26 = vld [vmem:[%s3884_s4 + $0xc0] sm:$0xff] }
 0x228   :  { %610 = vmatprep.subr.mxu1 %v2390_v3  ;;  %vm2180_vm6 = vmneg %vm3025_vm5 }
 0x229   :  { %611 = vmatpush1.msra.mxu1 %v502_v28  ;;  %vm2185_vm9 = vmneg %vm3009_vm15  ;;  %v2071_v28 = vld [vmem:[%s3894_s10 + $0x58] sm:$0xff] }
 0x22a   :  { %612 = vmatprep.subr.mxu1 %v2390_v3 }
 0x22b   :  { %613 = vmatpush1.msra.mxu1 %v501_v23 }
 0x22c   :  { %614 = vmatprep.subr.mxu1 %v2390_v3 }
 0x22d   :  { %615 = vmatpush1.msra.mxu1 %v500_v29 }
 0x22e   :  { %616 = vmatprep.subr.mxu1 %v2390_v3 }
 0x22f   :  { %617 = vmatpush1.msra.mxu1 %v499_v30 }
 0x230   :  { %618 = vmatprep.subr.mxu1 %v2390_v3 }
 0x231   :  { %619 = vmatpush1.msra.mxu1 %v498_v31 }
 0x232   :  { %620 = vmatprep.subr.mxu1 %v2390_v3 }
 0x233   :  { %621 = vmatpush1.msra.mxu1 %v497_v32 }
 0x234   :  { %622 = vmatprep.subr.mxu1 %v2390_v3 }
 0x235   :  { %623 = vmatpush1.msra.mxu1 %v496_v33 }
 0x236   :  { %624 = vmatprep.subr.mxu1 %v2390_v3 }
 0x237   :  { %625 = vmatpush1.msra.mxu1 %v495_v34 }
 0x238   :  { %626 = vmatprep.subr.mxu1 %v2390_v3 }
 0x239   :  { %627 = vmatpush1.msra.mxu1 %v494_v36 }
 0x23a   :  { %658 = vmatprep.subr.mxu1 %v2390_v3 }
 0x23b   :  { %2174 = vmatpush2.msk.msra.mxu1 %vm78_vm0, %v510_v38 }
 0x23c   :  { %661 = vmatmul.mubr.f32.vlgmr.msra.gmra.mxu1 %v451_v22 }
 0x23d   :  { %2176 = vmatprep.mubr.msk.f32.mxu1 %vm511_vm13, %v459_v39 }
 0x240   :  { %666 = vmatmul.mubr.f32.gmra.mxu1 %v457_v37 }
 0x241   :  { %905 = vmatprep.mubr.f32.mxu1 %v2390_v3 }
 0x2da   :  { %v2243_v2 = vpop.f32.mrf.mxu1 }
 0x2dc   :  { %v2244_v5 = vpop.f32.mrf.mxu1 }
 0x2dd   :  { %v2245_v8 = vadd.f32 %v2244_v5, %v2243_v2 }
 0x2de   :  { %v2246_v6 = vpop.f32.mrf.mxu1 }
 0x2e0   :  { %v2247_v7 = vpop.f32.mrf.mxu1 }
 0x2e1   :  { %v2248_v12 = vadd.f32 %v2247_v7, %v2246_v6 }
 0x2fc   :  { %v662_v9 = vpop.f32.mrf.mxu1 }
 0x2fd   :  { %v663_v10 = vadd.f32 %v2245_v8, %v662_v9  ;;  %v1014_v8 = vld [vmem:[%s3884_s4 + $0xf8] sm:$0xff] }
 0x2fe   :  { %v664_v11 = vpop.f32.mrf.mxu1 }
 0x2ff   :  { %v2987_v13 = vmax.f32 %v663_v10, 0.0  ;;  %v998_v10 = vld [vmem:[%s3884_s4 + $0x78] sm:$0xff]  ;;  %v1013_v11 = vld [vmem:[%s3884_s4 + $0xf0] sm:$0xff] }
 0x300   :  { %v667_v14 = vpop.f32.mrf.mxu1 }
 0x301   :  { %v668_v15 = vadd.f32 %v2248_v12, %v667_v14  ;;  %697 = vrot.lane.b32.xlu0 %v2987_v13, %s2391_s28  ;;  %v687_v19 = vrot.slane %v2987_v13, 1  ;;  %v681_v27 = vrot.slane %v2987_v13, 7  ;;  %v997_v12 = vld [vmem:[%s3884_s4 + $0x70] sm:$0xff]  ;;  %v996_v14 = vld [vmem:[%s3884_s4 + $0x68] sm:$0xff] }
 0x302   :  { %v669_v16 = vpop.f32.mrf.mxu1 }
 0x303   :  { %v2991_v17 = vmax.f32 %v668_v15, 0.0  ;;  %v686_v31 = vsel %vm78_vm0, 0.0, %v681_v27  ;;  %v1011_v15 = vld [vmem:[%s3884_s4 + $0xe0] sm:$0xff] }
 0x304   :  { %v693_v33 = vsel %vm3015_vm4, 0.0, %v686_v31  ;;  %v995_v16 = vld [vmem:[%s3884_s4 + $0x60] sm:$0xff]  ;;  %v1005_v31 = vld [vmem:[%s3884_s4 + $0xb0] sm:$0xff] }
 0x305   :  { %v688_v20 = vrot.slane %v2991_v17, 1  ;;  %699 = vrot.lane.b32.xlu1 %v2991_v17, %s2391_s28  ;;  %v682_v29 = vrot.slane %v2991_v17, 7 }
 0x307   :  { %v689_v22 = vsel %vm91_vm1, %v687_v19, %v688_v20  ;;  %v692_v23 = vsel %vm91_vm1, %v688_v20, 0.0  ;;  %v683_v37 = vsel %vm78_vm0, %v681_v27, %v682_v29  ;;  %v994_v19 = vld [vmem:[%s3884_s4 + $0x58] sm:$0xff]  ;;  %v1009_v20 = vld [vmem:[%s3884_s4 + $0xd0] sm:$0xff]  ;;  %v991_v27 = vld [vmem:[%s3884_s4 + $0x40] sm:$0xff] }
 0x308   :  { %v695_v24 = vsel %vm2998_vm14, 0.0, %v689_v22  ;;  %v696_v32 = vsel %vm3009_vm15, 0.0, %v692_v23  ;;  %v694_v40 = vsel %vm3025_vm5, 0.0, %v683_v37  ;;  %v993_v22 = vld [vmem:[%s3884_s4 + $0x50] sm:$0xff]  ;;  %v1006_v23 = vld [vmem:[%s3884_s4 + $0xb8] sm:$0xff]  ;;  %v987_v37 = vld [vmem:[%s3884_s4 + $0x20] sm:$0xff] }
 0x309   :  { %v705_v25 = vsel %vm124_vm2, %v695_v24, 1.0  ;;  %v706_v38 = vsel %vm124_vm2, %v696_v32, 1.0  ;;  %v1008_v24 = vld [vmem:[%s3884_s4 + $0xc8] sm:$0xff]  ;;  %v990_v29 = vld [vmem:[%s3884_s4 + $0x38] sm:$0xff]  ;;  %v989_v32 = vld [vmem:[%s3884_s4 + $0x30] sm:$0xff] }
 0x30a   :  { %2178 = vmatprep.mubr.msk.f32.mxu0 %vm158_vm3, %v705_v25  ;;  %v992_v25 = vld [vmem:[%s3884_s4 + $0x48] sm:$0xff] }
 0x373   :  { %v698_v47 = vpop.permute.xlu0 %697 }
 0x374   :  { %v703_v34 = vsel %vm124_vm2, %v693_v33, %v698_v47  ;;  %v1004_v47 = vld [vmem:[%s3884_s4 + $0xa8] sm:$0xff] }
 0x375   :  { %806 = vmatmul.mubr.f32.vlgmr.msra.gmra.mxu0 %v703_v34  ;;  %v988_v33 = vld [vmem:[%s3884_s4 + $0x28] sm:$0xff]  ;;  %v1003_v34 = vld [vmem:[%s3884_s4 + $0xa0] sm:$0xff] }
 0x376   :  { %2179 = vmatprep.mubr.msk.f32.mxu0 %vm158_vm3, %v706_v38  ;;  %1109 = vmatpush1.msra.mxu0 %v1030_v42  ;;  %v1002_v38 = vld [vmem:[%s3884_s4 + $0x98] sm:$0xff]  ;;  %v1000_v42 = vld [vmem:[%s3884_s4 + $0x88] sm:$0xff] }
 0x377   :  { %v700_v39 = vpop.permute.xlu1 %699  ;;  %1110 = vmatprep.subr.mxu0 %v2390_v3 }
 0x378   :  { %v704_v41 = vsel %vm124_vm2, %v694_v40, %v700_v39  ;;  %1111 = vmatpush1.msra.mxu0 %v1029_v43  ;;  %v986_v39 = vld [vmem:[%s3884_s4 + $0x18] sm:$0xff]  ;;  %v1001_v40 = vld [vmem:[%s3884_s4 + $0x90] sm:$0xff]  ;;  %v984_v43 = vld [vmem:[%s3884_s4 + $0x8] sm:$0xff] }
 0x379   :  { %811 = vmatmul.mubr.f32.gmra.mxu0 %v704_v41  ;;  %1112 = vmatprep.subr.mxu0 %v2390_v3  ;;  %v985_v41 = vld [vmem:[%s3884_s4 + $0x10] sm:$0xff] }
 0x37a   :  { %1113 = vmatpush1.msra.mxu0 %v1028_v44  ;;  %v1017_v44 = vld [vmem:[%s3884_s4 + $0x110] sm:$0xff] }
 0x37b   :  { %1114 = vmatprep.subr.mxu0 %v2390_v3 }
 0x37c   :  { %1115 = vmatpush1.msra.mxu0 %v1027_v45  ;;  %v999_v45 = vld [vmem:[%s3884_s4 + $0x80] sm:$0xff] }
 0x37d   :  { %1116 = vmatprep.subr.mxu0 %v2390_v3 }
 0x37e   :  { %1117 = vmatpush1.msra.mxu0 %v1026_v48  ;;  %v983_v48 = vld [vmem:[%s3884_s4] sm:$0xff] }
 0x37f   :  { %1118 = vmatprep.subr.mxu0 %v2390_v3 }
 0x380   :  { %1119 = vmatpush1.msra.mxu0 %v1025_v49  ;;  %v1016_v49 = vld [vmem:[%s3884_s4 + $0x108] sm:$0xff] }
 0x381   :  { %1120 = vmatprep.subr.mxu0 %v2390_v3 }
 0x382   :  { %1121 = vmatpush1.msra.mxu0 %v1024_v50  ;;  %v1015_v50 = vld [vmem:[%s3884_s4 + $0x100] sm:$0xff] }
 0x383   :  { %1122 = vmatprep.subr.mxu0 %v2390_v3 }
 0x384   :  { %1123 = vmatpush1.msra.mxu0 %v1023_v51  ;;  %v1031_v51 = vld [vmem:[%s3884_s4 + $0x180] sm:$0x1] }
 0x385   :  { %1124 = vmatprep.subr.mxu0 %v2390_v3 }
 0x386   :  { %1125 = vmatpush1.msra.mxu0 %v1022_v52 }
 0x387   :  { %1126 = vmatprep.subr.mxu0 %v2390_v3 }
 0x388   :  { %1127 = vmatpush1.msra.mxu0 %v1021_v53 }
 0x389   :  { %1128 = vmatprep.subr.mxu0 %v2390_v3 }
 0x38a   :  { %1129 = vmatpush1.msra.mxu0 %v1020_v54 }
 0x38b   :  { %1130 = vmatprep.subr.mxu0 %v2390_v3 }
 0x38c   :  { %1131 = vmatpush1.msra.mxu0 %v1019_v55 }
 0x38d   :  { %1132 = vmatprep.subr.mxu0 %v2390_v3 }
 0x38e   :  { %1133 = vmatpush1.msra.mxu0 %v1018_v56 }
 0x38f   :  { %1134 = vmatprep.subr.mxu0 %v2390_v3 }
 0x390   :  { %1135 = vmatpush1.msra.mxu0 %v1017_v44 }
 0x391   :  { %1136 = vmatprep.subr.mxu0 %v2390_v3 }
 0x392   :  { %1137 = vmatpush1.msra.mxu0 %v1016_v49  ;;  %v1374_v49 = vld [vmem:[%s3888_s14] sm:$0xff] }
 0x393   :  { %1138 = vmatprep.subr.mxu0 %v2390_v3 }
 0x394   :  { %1139 = vmatpush1.msra.mxu0 %v1015_v50 }
 0x395   :  { %1170 = vmatprep.subr.mxu0 %v2390_v3 }
 0x396   :  { %2190 = vmatpush2.msk.msra.mxu0 %vm78_vm0, %v1031_v51  ;;  %v1485_v51 = vld [vmem:[%s3889_s6 + $0x60] sm:$0x1] }
 0x397   :  { %2322 = vmatprep.subr.mxu0 %v2390_v3 }
 0x435   :  { %v807_v57 = vpop.f32.mrf.mxu0 }
 0x436   :  { %v816_v59 = vmax.f32 %v807_v57, 0.0 }
 0x437   :  { %v809_v58 = vpop.f32.mrf.mxu0 }
 0x438   :  { %v820_v63 = vrot.slane %v816_v59, 7  ;;  %v826_v6 = vrot.slane %v816_v59, 1 }
 0x439   :  { %v812_v60 = vpop.f32.mrf.mxu0 }
 0x43a   :  { %v817_v61 = vmax.f32 %v812_v60, 0.0  ;;  %v825_v5 = vsel %vm78_vm0, 0.0, %v820_v63 }
 0x43b   :  { %v814_v62 = vpop.f32.mrf.mxu0 }
 0x43c   :  { %v821_v0 = vrot.slane %v817_v61, 7  ;;  %869 = vmatprep.subr.mxu1 %v817_v61  ;;  %v827_v1 = vrot.slane %v817_v61, 1  ;;  %v1179_v61 = vand.u32 3, %v2631_v46 }
 0x43e   :  { %v822_v2 = vsel %vm78_vm0, %v820_v63, %v821_v0  ;;  %v831_v7 = vsel %vm91_vm1, %v827_v1, 0.0  ;;  %v828_v9 = vsel %vm91_vm1, %v826_v6, %v827_v1  ;;  %vm3227_vm12 = vcmp.eq.s32.totalorder %v1179_v61, 3  ;;  %v1952_v0 = vld [vmem:[%s3893_s9 + $0x78] sm:$0xff] }
 0x43f   :  { %2181 = vmatpush1.msk.msra.mxu1 %vm2180_vm6, %v822_v2  ;;  %vm1197_vm6 = vcmask 64512  }
 0x440   :  { %871 = vmatprep.subr.mxu1 %v816_v59 }
 0x441   :  { %2183 = vmatpush1.msk.msra.mxu1 %vm2182_vm7, %v825_v5  ;;  %vm2393_vm7 = vmmov 0  }
 0x442   :  { %2184 = vmatmul.mubr.msk.f32.vlgmr.msra.gmra.mxu1 %vm837_vm8, %v836_v4  ;;  %940 = vmatprep.subr.mxu1 %v2392_v35 }
 0x443   :  { %2186 = vmatpush1.msk.msra.mxu1 %vm2185_vm9, %v831_v7  ;;  %976 = vmatprep.mubr.f32.mxu1 %v2390_v3  ;;  %vm1375_vm9 = vcmask 31744   ;;  %v2066_v7 = vld [vmem:[%s3894_s10 + $0x30] sm:$0xff] }
 0x444   :  { %942 = vmatprep.subr.mxu1 %v2392_v35  ;;  %v1012_v35 = vld [vmem:[%s3884_s4 + $0xe8] sm:$0xff] }
 0x445   :  { %2188 = vmatpush1.msk.msra.mxu1 %vm2187_vm11, %v828_v9  ;;  %vm1471_vm11 = vcmask 785408  }
 0x446   :  { %2189 = vmatmul.mubr.msk.f32.vlgmr.msra.gmra.mxu1 %vm837_vm8, %v836_v4  ;;  %2249 = vmatprep.subr.mxu1 %v1014_v8  ;;  %vm1379_vm8 = vcmask 1043456  }
 0x447   :  { %2250 = vmatpush3.msra.mxu1 %v998_v10 }
 0x448   :  { %2251 = vmatprep.subr.mxu1 %v1013_v11  ;;  %v1196_v11 = vld [vmem:[%s3886_s13] sm:$0xf] }
 0x449   :  { %2252 = vmatpush3.msra.mxu1 %v997_v12 }
 0x44a   :  { %2253 = vmatprep.subr.mxu1 %v1012_v35  ;;  %v1287_v35 = vld [vmem:[%s3887_s5 + $0x78] sm:$0xff] }
 0x44b   :  { %2254 = vmatpush3.msra.mxu1 %v996_v14  ;;  %v1286_v14 = vld [vmem:[%s3887_s5 + $0x70] sm:$0xff] }
 0x44c   :  { %2255 = vmatprep.subr.mxu1 %v1011_v15  ;;  %v1285_v15 = vld [vmem:[%s3887_s5 + $0x68] sm:$0xff] }
 0x44d   :  { %2256 = vmatpush3.msra.mxu1 %v995_v16  ;;  %v1284_v16 = vld [vmem:[%s3887_s5 + $0x60] sm:$0xff] }
 0x44e   :  { %2257 = vmatprep.subr.mxu1 %v1010_v18  ;;  %v1283_v18 = vld [vmem:[%s3887_s5 + $0x58] sm:$0xff] }
 0x44f   :  { %2258 = vmatpush3.msra.mxu1 %v994_v19  ;;  %v1282_v19 = vld [vmem:[%s3887_s5 + $0x50] sm:$0xff] }
 0x450   :  { %2259 = vmatprep.subr.mxu1 %v1009_v20  ;;  %v1281_v20 = vld [vmem:[%s3887_s5 + $0x48] sm:$0xff] }
 0x451   :  { %2260 = vmatpush3.msra.mxu1 %v993_v22  ;;  %v1280_v22 = vld [vmem:[%s3887_s5 + $0x40] sm:$0xff] }
 0x452   :  { %2261 = vmatprep.subr.mxu1 %v1008_v24  ;;  %v1279_v24 = vld [vmem:[%s3887_s5 + $0x38] sm:$0xff] }
 0x453   :  { %2262 = vmatpush3.msra.mxu1 %v992_v25  ;;  %v1278_v25 = vld [vmem:[%s3887_s5 + $0x30] sm:$0xff] }
 0x454   :  { %2263 = vmatprep.subr.mxu1 %v1007_v26  ;;  %v1277_v26 = vld [vmem:[%s3887_s5 + $0x28] sm:$0xff] }
 0x455   :  { %2264 = vmatpush3.msra.mxu1 %v991_v27  ;;  %v1276_v27 = vld [vmem:[%s3887_s5 + $0x20] sm:$0xff] }
 0x456   :  { %2265 = vmatprep.subr.mxu1 %v1006_v23  ;;  %v1275_v23 = vld [vmem:[%s3887_s5 + $0x18] sm:$0xff] }
 0x457   :  { %2266 = vmatpush3.msra.mxu1 %v990_v29  ;;  %v1274_v29 = vld [vmem:[%s3887_s5 + $0x10] sm:$0xff] }
 0x458   :  { %2267 = vmatprep.subr.mxu1 %v1005_v31  ;;  %v1273_v31 = vld [vmem:[%s3887_s5 + $0x8] sm:$0xff] }
 0x459   :  { %2268 = vmatpush3.msra.mxu1 %v989_v32  ;;  %v1272_v32 = vld [vmem:[%s3887_s5] sm:$0xff] }
 0x45a   :  { %2269 = vmatprep.subr.mxu1 %v1004_v47  ;;  %v1296_v47 = vld [vmem:[%s3887_s5 + $0xc0] sm:$0x1] }
 0x45b   :  { %2270 = vmatpush3.msra.mxu1 %v988_v33  ;;  %v1295_v33 = vld [vmem:[%s3887_s5 + $0xb8] sm:$0xff] }
 0x45c   :  { %2271 = vmatprep.subr.mxu1 %v1003_v34  ;;  %v1294_v34 = vld [vmem:[%s3887_s5 + $0xb0] sm:$0xff] }
 0x45d   :  { %2272 = vmatpush3.msra.mxu1 %v987_v37  ;;  %v1293_v37 = vld [vmem:[%s3887_s5 + $0xa8] sm:$0xff] }
 0x45e   :  { %2273 = vmatprep.subr.mxu1 %v1002_v38  ;;  %v1292_v38 = vld [vmem:[%s3887_s5 + $0xa0] sm:$0xff] }
 0x45f   :  { %2274 = vmatpush3.msra.mxu1 %v986_v39  ;;  %v1291_v39 = vld [vmem:[%s3887_s5 + $0x98] sm:$0xff] }
 0x460   :  { %2275 = vmatprep.subr.mxu1 %v1001_v40  ;;  %v1290_v40 = vld [vmem:[%s3887_s5 + $0x90] sm:$0xff] }
 0x461   :  { %2276 = vmatpush3.msra.mxu1 %v985_v41  ;;  %v1289_v41 = vld [vmem:[%s3887_s5 + $0x88] sm:$0xff] }
 0x462   :  { %2277 = vmatprep.subr.mxu1 %v1000_v42  ;;  %v1288_v42 = vld [vmem:[%s3887_s5 + $0x80] sm:$0xff] }
 0x463   :  { %2278 = vmatpush3.msra.mxu1 %v984_v43 }
 0x464   :  { %2279 = vmatprep.subr.mxu1 %v999_v45 }
 0x465   :  { %2280 = vmatpush3.msra.mxu1 %v983_v48 }
 0x502   :  { %v907_v52 = vpop.f32.mrf.mxu1 }
 0x504   :  { %v909_v53 = vpop.f32.mrf.mxu1 }
 0x505   :  { %1102 = vmatprep.mubr.f32.mxu1 %v909_v53  ;;  %v1483_v53 = vld [vmem:[%s3889_s6 + $0x50] sm:$0xff] }
 0x506   :  { %v978_v54 = vpop.f32.mrf.mxu1  ;;  %1103 = vmatmul.mubr.f32.vlgmr.msra.gmra.mxu1 %v907_v52  ;;  %v1484_v52 = vld [vmem:[%s3889_s6 + $0x58] sm:$0xff] }
 0x507   :  { %1265 = vmatprep.mubr.f32.mxu1 %v2390_v3 }
 0x508   :  { %v980_v55 = vpop.f32.mrf.mxu1 }
 0x509   :  { %2191 = vmatprep.mubr.msk.f32.mxu0 %vm511_vm13, %v980_v55  ;;  %vm3237_vm13 = vcmp.eq.s32.totalorder %v1179_v61, 0  ;;  %v1481_v55 = vld [vmem:[%s3889_s6 + $0x40] sm:$0xff]  ;;  %v1475_v61 = vld [vmem:[%s3889_s6 + $0x10] sm:$0xff] }
 0x50a   :  { %1173 = vmatmul.mubr.f32.vlgmr.msra.gmra.mxu0 %v978_v54  ;;  %v1482_v54 = vld [vmem:[%s3889_s6 + $0x48] sm:$0xff] }
 0x50b   :  { %2348 = vmatprep.mubr.msk.f32.mxu0 %vm2393_vm7, %v2390_v3  ;;  %2323 = vmatpush3.msk.msra.mxu0 %vm78_vm0, %v1485_v51  ;;  %v1693_v51 = vld [vmem:[%s3891_s7 + $0x90] sm:$0xff] }
 0x50c   :  { %2324 = vmatprep.subr.mxu0 %v2390_v3 }
 0x50d   :  { %2325 = vmatpush3.msra.mxu0 %v1484_v52  ;;  %v1692_v52 = vld [vmem:[%s3891_s7 + $0x88] sm:$0xff] }
 0x50e   :  { %2326 = vmatprep.subr.mxu0 %v2390_v3 }
 0x50f   :  { %2327 = vmatpush3.msra.mxu0 %v1483_v53  ;;  %v1691_v53 = vld [vmem:[%s3891_s7 + $0x80] sm:$0xff] }
 0x510   :  { %2328 = vmatprep.subr.mxu0 %v2390_v3 }
 0x511   :  { %2329 = vmatpush3.msra.mxu0 %v1482_v54 }
 0x512   :  { %2330 = vmatprep.subr.mxu0 %v2390_v3 }
 0x513   :  { %2331 = vmatpush3.msra.mxu0 %v1481_v55 }
 0x514   :  { %2332 = vmatprep.subr.mxu0 %v2390_v3 }
 0x5c6   :  { %v2281_v56 = vpop.f32.mrf.mxu1 }
 0x5c8   :  { %v2282_v57 = vpop.f32.mrf.mxu1 }
 0x5c9   :  { %v2283_v58 = vadd.f32 %v2282_v57, %v2281_v56  ;;  %v1480_v56 = vld [vmem:[%s3889_s6 + $0x38] sm:$0xff]  ;;  %v1479_v57 = vld [vmem:[%s3889_s6 + $0x30] sm:$0xff] }
 0x5ca   :  { %v1174_v59 = vpop.f32.mrf.mxu0  ;;  %2333 = vmatpush3.msra.mxu0 %v1480_v56 }
 0x5cb   :  { %v1175_v60 = vadd.f32 %v2283_v58, %v1174_v59  ;;  %2334 = vmatprep.subr.mxu0 %v2390_v3  ;;  %v1478_v58 = vld [vmem:[%s3889_s6 + $0x28] sm:$0xff]  ;;  %v1477_v59 = vld [vmem:[%s3889_s6 + $0x20] sm:$0xff] }
 0x5cc   :  { %v1176_v62 = vpop.f32.mrf.mxu0  ;;  %2335 = vmatpush3.msra.mxu0 %v1479_v57 }
 0x5cd   :  { %v3223_v63 = vmax.f32 %v1175_v60, 0.0  ;;  %2336 = vmatprep.subr.mxu0 %v2390_v3  ;;  %v1476_v60 = vld [vmem:[%s3889_s6 + $0x18] sm:$0xff]  ;;  %v1474_v62 = vld [vmem:[%s3889_s6 + $0x8] sm:$0xff] }
 0x5ce   :  { %2337 = vmatpush3.msra.mxu0 %v1478_v58 }
 0x5cf   :  { %1191 = vrot.lane.b32.xlu0 %v3223_v63, %s2391_s28  ;;  %v1186_v1 = vrot.slane %v3223_v63, 1  ;;  %v1183_v6 = vrot.slane %v3223_v63, 7  ;;  %2338 = vmatprep.subr.mxu0 %v2390_v3 }
 0x5d0   :  { %2339 = vmatpush3.msra.mxu0 %v1477_v59 }
 0x5d1   :  { %v1188_v2 = vsel %vm91_vm1, %v1186_v1, 0.0  ;;  %v1185_v8 = vsel %vm78_vm0, 0.0, %v1183_v6  ;;  %2340 = vmatprep.subr.mxu0 %v2390_v3  ;;  %v1473_v1 = vld [vmem:[%s3889_s6] sm:$0xff] }
 0x5d2   :  { %v1190_v4 = vsel %vm3227_vm12, 0.0, %v1188_v2  ;;  %v1189_v10 = vsel %vm3237_vm13, 0.0, %v1185_v8  ;;  %2341 = vmatpush3.msra.mxu0 %v1476_v60 }
 0x5d3   :  { %v1195_v5 = vsel %vm124_vm2, %v1190_v4, 1.0  ;;  %2342 = vmatprep.subr.mxu0 %v2390_v3 }
 0x5d4   :  { %1231 = vmatprep.subr.mxu1 %v1195_v5  ;;  %2343 = vmatpush3.msra.mxu0 %v1475_v61 }
 0x5d5   :  { %2344 = vmatprep.subr.mxu0 %v2390_v3 }
 0x5d6   :  { %2345 = vmatpush3.msra.mxu0 %v1474_v62 }
 0x5d7   :  { %2346 = vmatprep.subr.mxu0 %v2390_v3 }
 0x5d8   :  { %2347 = vmatpush3.msra.mxu0 %v1473_v1 }
 0x641   :  { %v1192_v9 = vpop.permute.xlu0 %1191 }
 0x642   :  { %v1194_v12 = vsel %vm124_vm2, %v1189_v10, %v1192_v9 }
 0x643   :  { %1232 = vmatpush1.msra.mxu1 %v1194_v12 }
 0x644   :  { %2192 = vmatmul.mubr.msk.f32.vlgmr.msra.gmra.mxu1 %vm1197_vm6, %v1196_v11  ;;  %1303 = vmatprep.subr.mxu1 %v2390_v3 }
 0x645   :  { %1304 = vmatpush1.msra.mxu1 %v1287_v35 }
 0x646   :  { %1305 = vmatprep.subr.mxu1 %v2390_v3 }
 0x647   :  { %1306 = vmatpush1.msra.mxu1 %v1286_v14 }
 0x648   :  { %1307 = vmatprep.subr.mxu1 %v2390_v3 }
 0x649   :  { %1308 = vmatpush1.msra.mxu1 %v1285_v15 }
 0x64a   :  { %1309 = vmatprep.subr.mxu1 %v2390_v3 }
 0x64b   :  { %1310 = vmatpush1.msra.mxu1 %v1284_v16 }
 0x64c   :  { %1311 = vmatprep.subr.mxu1 %v2390_v3 }
 0x64d   :  { %1312 = vmatpush1.msra.mxu1 %v1283_v18  ;;  %v1564_v18 = vld [vmem:[%s3890_s15] sm:$0xff] }
 0x64e   :  { %1313 = vmatprep.subr.mxu1 %v2390_v3 }
 0x64f   :  { %1314 = vmatpush1.msra.mxu1 %v1282_v19 }
 0x650   :  { %1315 = vmatprep.subr.mxu1 %v2390_v3 }
 0x651   :  { %1316 = vmatpush1.msra.mxu1 %v1281_v20 }
 0x652   :  { %1317 = vmatprep.subr.mxu1 %v2390_v3 }
 0x653   :  { %1318 = vmatpush1.msra.mxu1 %v1280_v22 }
 0x654   :  { %1319 = vmatprep.subr.mxu1 %v2390_v3 }
 0x655   :  { %1320 = vmatpush1.msra.mxu1 %v1279_v24  ;;  %v1565_v24 = vld [vmem:[%s3890_s15 + $0x8] sm:$0xff] }
 0x656   :  { %1321 = vmatprep.subr.mxu1 %v2390_v3 }
 0x657   :  { %1322 = vmatpush1.msra.mxu1 %v1278_v25  ;;  %v1690_v25 = vld [vmem:[%s3891_s7 + $0x78] sm:$0xff] }
 0x658   :  { %1323 = vmatprep.subr.mxu1 %v2390_v3 }
 0x659   :  { %1324 = vmatpush1.msra.mxu1 %v1277_v26  ;;  %v1688_v26 = vld [vmem:[%s3891_s7 + $0x68] sm:$0xff] }
 0x65a   :  { %1325 = vmatprep.subr.mxu1 %v2390_v3 }
 0x65b   :  { %1326 = vmatpush1.msra.mxu1 %v1276_v27  ;;  %v1687_v27 = vld [vmem:[%s3891_s7 + $0x60] sm:$0xff] }
 0x65c   :  { %1327 = vmatprep.subr.mxu1 %v2390_v3 }
 0x65d   :  { %1328 = vmatpush1.msra.mxu1 %v1275_v23  ;;  %v1686_v23 = vld [vmem:[%s3891_s7 + $0x58] sm:$0xff] }
 0x65e   :  { %1329 = vmatprep.subr.mxu1 %v2390_v3 }
 0x65f   :  { %1330 = vmatpush1.msra.mxu1 %v1274_v29  ;;  %v1685_v29 = vld [vmem:[%s3891_s7 + $0x50] sm:$0xff] }
 0x660   :  { %1331 = vmatprep.subr.mxu1 %v2390_v3 }
 0x661   :  { %1332 = vmatpush1.msra.mxu1 %v1273_v31  ;;  %v1684_v31 = vld [vmem:[%s3891_s7 + $0x48] sm:$0xff] }
 0x662   :  { %1333 = vmatprep.subr.mxu1 %v2390_v3 }
 0x663   :  { %1334 = vmatpush1.msra.mxu1 %v1272_v32  ;;  %v1683_v32 = vld [vmem:[%s3891_s7 + $0x40] sm:$0xff] }
 0x664   :  { %1349 = vmatprep.subr.mxu1 %v2390_v3 }
 0x665   :  { %2193 = vmatpush2.msk.msra.mxu1 %vm78_vm0, %v1296_v47  ;;  %v1682_v47 = vld [vmem:[%s3891_s7 + $0x38] sm:$0xff] }
 0x666   :  { %1351 = vmatprep.subr.mxu1 %v2390_v3 }
 0x667   :  { %1352 = vmatpush2.msra.mxu1 %v1295_v33  ;;  %v1681_v33 = vld [vmem:[%s3891_s7 + $0x30] sm:$0xff] }
 0x668   :  { %1353 = vmatprep.subr.mxu1 %v2390_v3 }
 0x669   :  { %1354 = vmatpush2.msra.mxu1 %v1294_v34  ;;  %v1680_v34 = vld [vmem:[%s3891_s7 + $0x28] sm:$0xff] }
 0x66a   :  { %1355 = vmatprep.subr.mxu1 %v2390_v3 }
 0x66b   :  { %1356 = vmatpush2.msra.mxu1 %v1293_v37  ;;  %v1679_v37 = vld [vmem:[%s3891_s7 + $0x20] sm:$0xff] }
 0x66c   :  { %1357 = vmatprep.subr.mxu1 %v2390_v3 }
 0x66d   :  { %1358 = vmatpush2.msra.mxu1 %v1292_v38  ;;  %v1678_v38 = vld [vmem:[%s3891_s7 + $0x18] sm:$0xff] }
 0x66e   :  { %1359 = vmatprep.subr.mxu1 %v2390_v3 }
 0x66f   :  { %1360 = vmatpush2.msra.mxu1 %v1291_v39  ;;  %v1677_v39 = vld [vmem:[%s3891_s7 + $0x10] sm:$0xff] }
 0x670   :  { %1361 = vmatprep.subr.mxu1 %v2390_v3 }
 0x671   :  { %1362 = vmatpush2.msra.mxu1 %v1290_v40  ;;  %v1676_v40 = vld [vmem:[%s3891_s7 + $0x8] sm:$0xff] }
 0x672   :  { %1363 = vmatprep.subr.mxu1 %v2390_v3 }
 0x673   :  { %1364 = vmatpush2.msra.mxu1 %v1289_v41  ;;  %v1675_v41 = vld [vmem:[%s3891_s7] sm:$0xff] }
 0x674   :  { %1365 = vmatprep.subr.mxu1 %v2390_v3 }
 0x675   :  { %1366 = vmatpush2.msra.mxu1 %v1288_v42  ;;  %v1699_v42 = vld [vmem:[%s3891_s7 + $0xc0] sm:$0x1] }
 0x676   :  { %2317 = vmatprep.subr.mxu1 %v2390_v3 }
 0x704   :  { %v1267_v43 = vpop.f32.mrf.mxu1 }
 0x706   :  { %v1269_v44 = vpop.f32.mrf.mxu1 }
 0x707   :  { %2194 = vmatprep.mubr.msk.f32.mxu1 %vm158_vm3, %v1269_v44  ;;  %v1697_v44 = vld [vmem:[%s3891_s7 + $0xb0] sm:$0xff] }
 0x708   :  { %1368 = vmatmul.mubr.f32.vlgmr.msra.gmra.mxu1 %v1267_v43  ;;  %v1698_v43 = vld [vmem:[%s3891_s7 + $0xb8] sm:$0xff] }
 0x709   :  { %2319 = vmatprep.mubr.msk.f32.mxu1 %vm2393_vm7, %v2390_v3 }
 0x7c8   :  { %v1369_v45 = vpop.f32.mrf.mxu1 }
 0x7c9   :  { %v3356_v48 = vmax.f32 %v1369_v45, 0.0  ;;  %v1696_v45 = vld [vmem:[%s3891_s7 + $0xa8] sm:$0xff] }
 0x7ca   :  { %v1371_v50 = vpop.f32.mrf.mxu1 }
 0x7cb   :  { %2318 = vmatpush3.msk.msra.mxu1 %vm1379_vm8, %v3356_v48  ;;  %vm1486_vm8 = vcmask 793600   ;;  %v1694_v50 = vld [vmem:[%s3891_s7 + $0x98] sm:$0xff] }
 0x7cc   :  { %2320 = vmatmul.mubr.msk.f32.vlgmr.msra.gmra.mxu1 %vm1375_vm9, %v1374_v49  ;;  %1848 = vmatprep.subr.mxu1 %v2390_v3  ;;  %v1695_v49 = vld [vmem:[%s3891_s7 + $0xa0] sm:$0xff] }
 0x88c   :  { %v1449_v2 = vpop.f32.mrf.mxu1 }
 0x88d   :  { %v1457_v4 = vrot.slane %v1449_v2, 1  ;;  %1462 = vrot.lane.b32.xlu1 %v1449_v2, %s2394_s11  ;;  %v1454_v9 = vrot.slane %v1449_v2, 7 }
 0x88e   :  { %v2321_v5 = vpop.f32.mrf.mxu1 }
 0x88f   :  { %v1459_v6 = vsel %vm91_vm1, %v1457_v4, 0.0  ;;  %v1456_v10 = vsel %vm78_vm0, 0.0, %v1454_v9 }
 0x890   :  { %v1461_v8 = vsel %vm3227_vm12, 0.0, %v1459_v6  ;;  %v1460_v12 = vsel %vm3237_vm13, 0.0, %v1456_v10 }
 0x891   :  { %1466 = vrot.lane.b32.xlu0 %v1461_v8, %s2391_s28 }
 0x8ff   :  { %v1463_v11 = vpop.permute.xlu1 %1462 }
 0x900   :  { %v1469_v35 = vsel %vm301_vm10, %v1460_v12, %v1463_v11 }
 0x903   :  { %v1467_v14 = vpop.permute.xlu0 %1466 }
 0x904   :  { %v1470_v15 = vsel %vm124_vm2, %v1469_v35, %v1467_v14 }
 0x905   :  { %v1472_v16 = vsel %vm1471_vm11, %v1470_v15, 1.0 }
 0x906   :  { %2349 = vmatmul.mubr.msk.f32.vlgmr.msra.gmra.mxu0 %vm1486_vm8, %v1472_v16 }
 0x907   :  { %2353 = vmatprep.mubr.msk.f32.mxu0 %vm1197_vm6, %v1564_v18 }
 0x9c6   :  { %v1559_v19 = vpop.f32.mrf.mxu0 }
 0x9c7   :  { %v3432_v20 = vadd.f32 %v1559_v19, %v3223_v63  ;;  %v1689_v63 = vld [vmem:[%s3891_s7 + $0x70] sm:$0xff]  ;;  %v1829_v19 = vld [vmem:[%s3892_s8 + $0x78] sm:$0xff] }
 0x9c8   :  { %v2350_v22 = vpop.f32.mrf.mxu0  ;;  %1849 = vmatpush1.msra.mxu1 %v1829_v19  ;;  %v2038_v19 = vand.u32 1, %v2631_v46 }
 0x9c9   :  { %2351 = vmatprep.subr.mxu0 %v3432_v20  ;;  %v1927_v1 = vrot.slane %v3432_v20, 1  ;;  %v1828_v22 = vld [vmem:[%s3892_s8 + $0x70] sm:$0xff]  ;;  %1850 = vmatprep.subr.mxu1 %v2390_v3 }
 0x9ca   :  { %2352 = vmatpush3.msra.mxu0 %v3432_v20  ;;  %1851 = vmatpush1.msra.mxu1 %v1828_v22  ;;  %v2044_v22 = vrot.slane %v3356_v48, 1 }
 0x9cb   :  { %2354 = vmatmul.mubr.msk.f32.vlgmr.msra.gmra.mxu0 %vm1197_vm6, %v1565_v24  ;;  %1709 = vmatprep.subr.mxu0 %v2390_v3  ;;  %v1929_v9 = vsel %vm91_vm1, %v1927_v1, 0.0  ;;  %v1827_v24 = vld [vmem:[%s3892_s8 + $0x68] sm:$0xff]  ;;  %vm2040_vm6 = vcmp.eq.s32.totalorder %v2038_v19, 1 }
 0x9cc   :  { %1710 = vmatpush1.msra.mxu0 %v1690_v25  ;;  %v1931_v14 = vsel %vm3227_vm12, 0.0, %v1929_v9  ;;  %v1951_v25 = vld [vmem:[%s3893_s9 + $0x70] sm:$0xff]  ;;  %1852 = vmatprep.subr.mxu1 %v2390_v3  ;;  %v1835_v1 = vld [vmem:[%s3892_s8 + $0xa8] sm:$0xff]  ;;  %v1830_v9 = vld [vmem:[%s3892_s8 + $0x80] sm:$0xff]  ;;  %vm2046_vm12 = vcmask 1042432  }
 0x9cd   :  { %1711 = vmatprep.subr.mxu0 %v2390_v3  ;;  %v1936_v18 = vsel %vm124_vm2, %v1931_v14, 1.0  ;;  %1853 = vmatpush1.msra.mxu1 %v1827_v24  ;;  %v1953_v14 = vld [vmem:[%s3893_s9 + $0x80] sm:$0xff] }
 0x9ce   :  { %1712 = vmatpush1.msra.mxu0 %v1689_v63  ;;  %v1950_v63 = vld [vmem:[%s3893_s9 + $0x68] sm:$0xff]  ;;  %1854 = vmatprep.subr.mxu1 %v2390_v3 }
 0x9cf   :  { %1713 = vmatprep.subr.mxu0 %v2390_v3 }
 0x9d0   :  { %1714 = vmatpush1.msra.mxu0 %v1688_v26  ;;  %v1826_v26 = vld [vmem:[%s3892_s8 + $0x60] sm:$0xff] }
 0x9d1   :  { %1715 = vmatprep.subr.mxu0 %v2390_v3  ;;  %1855 = vmatpush1.msra.mxu1 %v1826_v26 }
 0x9d2   :  { %1716 = vmatpush1.msra.mxu0 %v1687_v27  ;;  %v1949_v27 = vld [vmem:[%s3893_s9 + $0x60] sm:$0xff]  ;;  %1856 = vmatprep.subr.mxu1 %v2390_v3 }
 0x9d3   :  { %1717 = vmatprep.subr.mxu0 %v2390_v3 }
 0x9d4   :  { %1718 = vmatpush1.msra.mxu0 %v1686_v23  ;;  %v1825_v23 = vld [vmem:[%s3892_s8 + $0x58] sm:$0xff] }
 0x9d5   :  { %1719 = vmatprep.subr.mxu0 %v2390_v3  ;;  %1857 = vmatpush1.msra.mxu1 %v1825_v23 }
 0x9d6   :  { %1720 = vmatpush1.msra.mxu0 %v1685_v29  ;;  %v1948_v29 = vld [vmem:[%s3893_s9 + $0x58] sm:$0xff]  ;;  %1858 = vmatprep.subr.mxu1 %v2390_v3 }
 0x9d7   :  { %1721 = vmatprep.subr.mxu0 %v2390_v3 }
 0x9d8   :  { %1722 = vmatpush1.msra.mxu0 %v1684_v31  ;;  %v1824_v31 = vld [vmem:[%s3892_s8 + $0x50] sm:$0xff] }
 0x9d9   :  { %1723 = vmatprep.subr.mxu0 %v2390_v3  ;;  %1859 = vmatpush1.msra.mxu1 %v1824_v31 }
 0x9da   :  { %1724 = vmatpush1.msra.mxu0 %v1683_v32  ;;  %v1947_v32 = vld [vmem:[%s3893_s9 + $0x50] sm:$0xff]  ;;  %1860 = vmatprep.subr.mxu1 %v2390_v3 }
 0x9db   :  { %1725 = vmatprep.subr.mxu0 %v2390_v3 }
 0x9dc   :  { %1726 = vmatpush1.msra.mxu0 %v1682_v47  ;;  %v1823_v47 = vld [vmem:[%s3892_s8 + $0x48] sm:$0xff] }
 0x9dd   :  { %1727 = vmatprep.subr.mxu0 %v2390_v3  ;;  %1861 = vmatpush1.msra.mxu1 %v1823_v47 }
 0x9de   :  { %1728 = vmatpush1.msra.mxu0 %v1681_v33  ;;  %v1946_v33 = vld [vmem:[%s3893_s9 + $0x48] sm:$0xff]  ;;  %1862 = vmatprep.subr.mxu1 %v2390_v3 }
 0x9df   :  { %1729 = vmatprep.subr.mxu0 %v2390_v3 }
 0x9e0   :  { %1730 = vmatpush1.msra.mxu0 %v1680_v34  ;;  %v1822_v34 = vld [vmem:[%s3892_s8 + $0x40] sm:$0xff] }
 0x9e1   :  { %1731 = vmatprep.subr.mxu0 %v2390_v3  ;;  %1863 = vmatpush1.msra.mxu1 %v1822_v34 }
 0x9e2   :  { %1732 = vmatpush1.msra.mxu0 %v1679_v37  ;;  %v1945_v37 = vld [vmem:[%s3893_s9 + $0x40] sm:$0xff]  ;;  %1864 = vmatprep.subr.mxu1 %v2390_v3 }
 0x9e3   :  { %1733 = vmatprep.subr.mxu0 %v2390_v3 }
 0x9e4   :  { %1734 = vmatpush1.msra.mxu0 %v1678_v38  ;;  %v1821_v38 = vld [vmem:[%s3892_s8 + $0x38] sm:$0xff] }
 0x9e5   :  { %1735 = vmatprep.subr.mxu0 %v2390_v3  ;;  %1865 = vmatpush1.msra.mxu1 %v1821_v38 }
 0x9e6   :  { %1736 = vmatpush1.msra.mxu0 %v1677_v39  ;;  %v1944_v39 = vld [vmem:[%s3893_s9 + $0x38] sm:$0xff]  ;;  %1866 = vmatprep.subr.mxu1 %v2390_v3 }
 0x9e7   :  { %1737 = vmatprep.subr.mxu0 %v2390_v3 }
 0x9e8   :  { %1738 = vmatpush1.msra.mxu0 %v1676_v40  ;;  %v1820_v40 = vld [vmem:[%s3892_s8 + $0x30] sm:$0xff] }
 0x9e9   :  { %1739 = vmatprep.subr.mxu0 %v2390_v3  ;;  %1867 = vmatpush1.msra.mxu1 %v1820_v40 }
 0x9ea   :  { %1740 = vmatpush1.msra.mxu0 %v1675_v41  ;;  %v1943_v41 = vld [vmem:[%s3893_s9 + $0x30] sm:$0xff]  ;;  %1868 = vmatprep.subr.mxu1 %v2390_v3 }
 0x9eb   :  { %1755 = vmatprep.subr.mxu0 %v2390_v3 }
 0x9ec   :  { %2201 = vmatpush2.msk.msra.mxu0 %vm78_vm0, %v1699_v42  ;;  %v1819_v42 = vld [vmem:[%s3892_s8 + $0x28] sm:$0xff] }
 0x9ed   :  { %1757 = vmatprep.subr.mxu0 %v2390_v3  ;;  %1869 = vmatpush1.msra.mxu1 %v1819_v42 }
 0x9ee   :  { %1758 = vmatpush2.msra.mxu0 %v1698_v43  ;;  %v1942_v43 = vld [vmem:[%s3893_s9 + $0x28] sm:$0xff]  ;;  %1870 = vmatprep.subr.mxu1 %v2390_v3 }
 0x9ef   :  { %1759 = vmatprep.subr.mxu0 %v2390_v3 }
 0x9f0   :  { %1760 = vmatpush2.msra.mxu0 %v1697_v44  ;;  %v1818_v44 = vld [vmem:[%s3892_s8 + $0x20] sm:$0xff] }
 0x9f1   :  { %1761 = vmatprep.subr.mxu0 %v2390_v3  ;;  %1871 = vmatpush1.msra.mxu1 %v1818_v44 }
 0x9f2   :  { %1762 = vmatpush2.msra.mxu0 %v1696_v45  ;;  %v1941_v45 = vld [vmem:[%s3893_s9 + $0x20] sm:$0xff]  ;;  %1872 = vmatprep.subr.mxu1 %v2390_v3 }
 0x9f3   :  { %1763 = vmatprep.subr.mxu0 %v2390_v3 }
 0x9f4   :  { %1764 = vmatpush2.msra.mxu0 %v1695_v49  ;;  %v1817_v49 = vld [vmem:[%s3892_s8 + $0x18] sm:$0xff] }
 0x9f5   :  { %1765 = vmatprep.subr.mxu0 %v2390_v3  ;;  %1873 = vmatpush1.msra.mxu1 %v1817_v49 }
 0x9f6   :  { %1766 = vmatpush2.msra.mxu0 %v1694_v50  ;;  %v1940_v50 = vld [vmem:[%s3893_s9 + $0x18] sm:$0xff]  ;;  %1874 = vmatprep.subr.mxu1 %v2390_v3 }
 0x9f7   :  { %1767 = vmatprep.subr.mxu0 %v2390_v3 }
 0x9f8   :  { %1768 = vmatpush2.msra.mxu0 %v1693_v51  ;;  %v1816_v51 = vld [vmem:[%s3892_s8 + $0x10] sm:$0xff] }
 0x9f9   :  { %1769 = vmatprep.subr.mxu0 %v2390_v3  ;;  %1875 = vmatpush1.msra.mxu1 %v1816_v51 }
 0x9fa   :  { %1770 = vmatpush2.msra.mxu0 %v1692_v52  ;;  %v1939_v52 = vld [vmem:[%s3893_s9 + $0x10] sm:$0xff]  ;;  %1876 = vmatprep.subr.mxu1 %v2390_v3 }
 0x9fb   :  { %1771 = vmatprep.subr.mxu0 %v2390_v3 }
 0x9fc   :  { %1772 = vmatpush2.msra.mxu0 %v1691_v53  ;;  %v1815_v53 = vld [vmem:[%s3892_s8 + $0x8] sm:$0xff] }
 0x9fd   :  { %1968 = vmatprep.subr.mxu0 %v2390_v3  ;;  %1877 = vmatpush1.msra.mxu1 %v1815_v53 }
 0x9fe   :  { %1878 = vmatprep.subr.mxu1 %v2390_v3 }
 0xa8b   :  { %v2355_v54 = vpop.f32.mrf.mxu0 }
 0xa8c   :  { %1667 = vrot.lane.b32.xlu0 %v2355_v54, %s2391_s28  ;;  %v1656_v56 = vrot.slane %v2355_v54, 1  ;;  %v1650_v4 = vrot.slane %v2355_v54, 7  ;;  %v1938_v54 = vld [vmem:[%s3893_s9 + $0x8] sm:$0xff] }
 0xa8d   :  { %v1638_v55 = vpop.f32.mrf.mxu0 }
 0xa8e   :  { %v1655_v57 = vrot.slane %v1638_v55, 1  ;;  %1665 = vrot.lane.b32.xlu1 %v1638_v55, %s2391_s28  ;;  %v1649_v61 = vrot.slane %v1638_v55, 7  ;;  %v1660_v62 = vsel %vm91_vm1, %v1656_v56, 0.0  ;;  %v1814_v55 = vld [vmem:[%s3892_s8] sm:$0xff] }
 0xa8f   :  { %v1664_v5 = vsel %vm3009_vm15, 0.0, %v1660_v62  ;;  %1879 = vmatpush1.msra.mxu1 %v1814_v55  ;;  %v1959_v62 = vld [vmem:[%s3893_s9 + $0xb0] sm:$0xff]  ;;  %v2065_v55 = vld [vmem:[%s3894_s10 + $0x28] sm:$0xff] }
 0xa90   :  { %v1657_v58 = vsel %vm91_vm1, %v1655_v57, %v1656_v56  ;;  %v1654_v2 = vsel %vm78_vm0, 0.0, %v1649_v61  ;;  %v1651_v11 = vsel %vm78_vm0, %v1649_v61, %v1650_v4  ;;  %v1674_v35 = vsel %vm124_vm2, %v1664_v5, 1.0  ;;  %v1937_v56 = vld [vmem:[%s3893_s9] sm:$0xff]  ;;  %1894 = vmatprep.subr.mxu1 %v2390_v3  ;;  %v1836_v61 = vld [vmem:[%s3892_s8 + $0xb0] sm:$0xff]  ;;  %v1833_v5 = vld [vmem:[%s3892_s8 + $0x98] sm:$0xff] }
 0xa91   :  { %v1663_v59 = vsel %vm2998_vm14, 0.0, %v1657_v58  ;;  %v1661_v8 = vsel %vm3015_vm4, 0.0, %v1654_v2  ;;  %v1662_v15 = vsel %vm3025_vm5, 0.0, %v1651_v11  ;;  %v1838_v57 = vld [vmem:[%s3892_s8 + $0xc0] sm:$0x1]  ;;  %v1958_v2 = vld [vmem:[%s3893_s9 + $0xa8] sm:$0xff] }
 0xa92   :  { %v1673_v60 = vsel %vm124_vm2, %v1663_v59, 1.0  ;;  %v1961_v58 = vld [vmem:[%s3893_s9 + $0xc0] sm:$0x1]  ;;  %v1837_v59 = vld [vmem:[%s3892_s8 + $0xb8] sm:$0xff]  ;;  %2204 = vmatpush2.msk.msra.mxu1 %vm78_vm0, %v1838_v57 }
 0xa93   :  { %2202 = vmatprep.mubr.msk.f32.mxu0 %vm158_vm3, %v1673_v60  ;;  %v1960_v60 = vld [vmem:[%s3893_s9 + $0xb8] sm:$0xff]  ;;  %1896 = vmatprep.subr.mxu1 %v2390_v3  ;;  %v1834_v4 = vld [vmem:[%s3892_s8 + $0xa0] sm:$0xff] }
 0xa94   :  { %1897 = vmatpush2.msra.mxu1 %v1837_v59  ;;  %v1956_v11 = vld [vmem:[%s3893_s9 + $0x98] sm:$0xff]  ;;  %v2064_v57 = vld [vmem:[%s3894_s10 + $0x20] sm:$0xff] }
 0xa95   :  { %1898 = vmatprep.subr.mxu1 %v2390_v3 }
 0xa96   :  { %1899 = vmatpush2.msra.mxu1 %v1836_v61 }
 0xa97   :  { %1900 = vmatprep.subr.mxu1 %v2390_v3 }
 0xa98   :  { %1901 = vmatpush2.msra.mxu1 %v1835_v1 }
 0xa99   :  { %1902 = vmatprep.subr.mxu1 %v2390_v3 }
 0xa9a   :  { %1903 = vmatpush2.msra.mxu1 %v1834_v4 }
 0xa9b   :  { %1904 = vmatprep.subr.mxu1 %v2390_v3 }
 0xa9c   :  { %1905 = vmatpush2.msra.mxu1 %v1833_v5 }
 0xa9d   :  { %1906 = vmatprep.subr.mxu1 %v2390_v3 }
 0xafe   :  { %v1668_v12 = vpop.permute.xlu0 %1667 }
 0xaff   :  { %v1672_v16 = vsel %vm124_vm2, %v1662_v15, %v1668_v12  ;;  %v1955_v12 = vld [vmem:[%s3893_s9 + $0x90] sm:$0xff] }
 0xb00   :  { %v1666_v6 = vpop.permute.xlu1 %1665 }
 0xb01   :  { %v1671_v10 = vsel %vm124_vm2, %v1661_v8, %v1666_v6  ;;  %v1832_v6 = vld [vmem:[%s3892_s8 + $0x90] sm:$0xff]  ;;  %v1831_v8 = vld [vmem:[%s3892_s8 + $0x88] sm:$0xff] }
 0xb02   :  { %1774 = vmatmul.mubr.f32.vlgmr.msra.gmra.mxu0 %v1671_v10  ;;  %1907 = vmatpush2.msra.mxu1 %v1832_v6  ;;  %v1957_v10 = vld [vmem:[%s3893_s9 + $0xa0] sm:$0xff] }
 0xb03   :  { %2203 = vmatprep.mubr.msk.f32.mxu0 %vm158_vm3, %v1674_v35  ;;  %1969 = vmatpush1.msra.mxu0 %v1952_v0  ;;  %v1954_v35 = vld [vmem:[%s3893_s9 + $0x88] sm:$0xff] }
 0xb04   :  { %1970 = vmatprep.subr.mxu0 %v2390_v3  ;;  %1908 = vmatprep.subr.mxu1 %v2390_v3 }
 0xb05   :  { %1971 = vmatpush1.msra.mxu0 %v1951_v25  ;;  %1909 = vmatpush2.msra.mxu1 %v1831_v8 }
 0xb06   :  { %1779 = vmatmul.mubr.f32.gmra.mxu0 %v1672_v16  ;;  %1972 = vmatprep.subr.mxu0 %v2390_v3 }
 0xb07   :  { %2208 = vmatprep.mubr.msk.f32.mxu0 %vm158_vm3, %v1936_v18  ;;  %1973 = vmatpush1.msra.mxu0 %v1950_v63  ;;  %v2047_v63 = vsel %vm2046_vm12, %v2044_v22, 0.0 }
 0xb08   :  { %1974 = vmatprep.subr.mxu0 %v2390_v3  ;;  %1910 = vmatprep.subr.mxu1 %v2390_v3 }
 0xb09   :  { %1975 = vmatpush1.msra.mxu0 %v1949_v27  ;;  %1911 = vmatpush2.msra.mxu1 %v1830_v9 }
 0xb0a   :  { %1976 = vmatprep.subr.mxu0 %v2390_v3  ;;  %2356 = vmatprep.subr.mxu1 %v2390_v3 }
 0xb0b   :  { %1977 = vmatpush1.msra.mxu0 %v1948_v29 }
 0xb0c   :  { %1978 = vmatprep.subr.mxu0 %v2390_v3 }
 0xb0d   :  { %1979 = vmatpush1.msra.mxu0 %v1947_v32  ;;  %v2049_v32 = vsel %vm2040_vm6, 0.0, %v2047_v63 }
 0xb0e   :  { %1980 = vmatprep.subr.mxu0 %v2390_v3 }
 0xb0f   :  { %1981 = vmatpush1.msra.mxu0 %v1946_v33 }
 0xb10   :  { %1982 = vmatprep.subr.mxu0 %v2390_v3 }
 0xb11   :  { %1983 = vmatpush1.msra.mxu0 %v1945_v37 }
 0xb12   :  { %1984 = vmatprep.subr.mxu0 %v2390_v3 }
 0xb13   :  { %1985 = vmatpush1.msra.mxu0 %v1944_v39  ;;  %v2072_v39 = vld [vmem:[%s3894_s10 + $0x60] sm:$0x1] }
 0xb14   :  { %1986 = vmatprep.subr.mxu0 %v2390_v3 }
 0xb15   :  { %1987 = vmatpush1.msra.mxu0 %v1943_v41  ;;  %v1924_v41 = vrot.slane %v3432_v20, 7 }
 0xb16   :  { %1988 = vmatprep.subr.mxu0 %v2390_v3 }
 0xb17   :  { %1989 = vmatpush1.msra.mxu0 %v1942_v43  ;;  %v1926_v49 = vsel %vm78_vm0, 0.0, %v1924_v41 }
 0xb18   :  { %1990 = vmatprep.subr.mxu0 %v2390_v3  ;;  %v1930_v36 = vsel %vm3237_vm13, 0.0, %v1926_v49 }
 0xb19   :  { %1991 = vmatpush1.msra.mxu0 %v1941_v45 }
 0xb1a   :  { %1992 = vmatprep.subr.mxu0 %v2390_v3 }
 0xb1b   :  { %1993 = vmatpush1.msra.mxu0 %v1940_v50  ;;  %v2069_v50 = vld [vmem:[%s3894_s10 + $0x48] sm:$0xff] }
 0xb1c   :  { %1994 = vmatprep.subr.mxu0 %v2390_v3 }
 0xb1d   :  { %1995 = vmatpush1.msra.mxu0 %v1939_v52  ;;  %v2068_v52 = vld [vmem:[%s3894_s10 + $0x40] sm:$0xff] }
 0xb1e   :  { %1996 = vmatprep.subr.mxu0 %v2390_v3 }
 0xb1f   :  { %1997 = vmatpush1.msra.mxu0 %v1938_v54  ;;  %v2067_v54 = vld [vmem:[%s3894_s10 + $0x38] sm:$0xff] }
 0xb20   :  { %1998 = vmatprep.subr.mxu0 %v2390_v3 }
 0xb21   :  { %1999 = vmatpush1.msra.mxu0 %v1937_v56  ;;  %v2041_v56 = vrot.slane %v3356_v48, 7 }
 0xb22   :  { %2014 = vmatprep.subr.mxu0 %v2390_v3 }
 0xb23   :  { %2207 = vmatpush2.msk.msra.mxu0 %vm78_vm0, %v1961_v58  ;;  %v2063_v58 = vld [vmem:[%s3894_s10 + $0x18] sm:$0xff]  ;;  %v2043_v59 = vsel %vm78_vm0, 0.0, %v2041_v56 }
 0xb24   :  { %2016 = vmatprep.subr.mxu0 %v2390_v3 }
 0xb25   :  { %2017 = vmatpush2.msra.mxu0 %v1960_v60 }
 0xb26   :  { %2018 = vmatprep.subr.mxu0 %v2390_v3 }
 0xb27   :  { %2019 = vmatpush2.msra.mxu0 %v1959_v62  ;;  %v2061_v62 = vld [vmem:[%s3894_s10 + $0x8] sm:$0xff] }
 0xb28   :  { %2020 = vmatprep.subr.mxu0 %v2390_v3 }
 0xb29   :  { %2021 = vmatpush2.msra.mxu0 %v1958_v2  ;;  %v2060_v2 = vld [vmem:[%s3894_s10] sm:$0xff] }
 0xb2a   :  { %2022 = vmatprep.subr.mxu0 %v2390_v3 }
 0xb2b   :  { %2023 = vmatpush2.msra.mxu0 %v1957_v10 }
 0xb2c   :  { %2024 = vmatprep.subr.mxu0 %v2390_v3 }
 0xb2d   :  { %2025 = vmatpush2.msra.mxu0 %v1956_v11 }
 0xb2e   :  { %2026 = vmatprep.subr.mxu0 %v2390_v3 }
 0xb2f   :  { %2027 = vmatpush2.msra.mxu0 %v1955_v12 }
 0xb30   :  { %2028 = vmatprep.subr.mxu0 %v2390_v3 }
 0xb31   :  { %2029 = vmatpush2.msra.mxu0 %v1954_v35 }
 0xb32   :  { %2030 = vmatprep.subr.mxu0 %v2390_v3 }
 0xb33   :  { %2031 = vmatpush2.msra.mxu0 %v1953_v14 }
 0xbc2   :  { %v1775_v15 = vpop.f32.mrf.mxu0 }
 0xbc3   :  { %v1784_v16 = vadd.f32 %v1775_v15, %v2987_v13 }
 0xbc4   :  { %v1777_v18 = vpop.f32.mrf.mxu0 }
 0xbc5   :  { %1804 = vrot.lane.b32.xlu1 %v1784_v16, %s2391_s28  ;;  %v1788_v26 = vrot.slane %v1784_v16, 7  ;;  %v1794_v27 = vrot.slane %v1784_v16, 1 }
 0xbc6   :  { %v1780_v0 = vpop.f32.mrf.mxu0 }
 0xbc7   :  { %v1785_v24 = vadd.f32 %v1780_v0, %v2991_v17  ;;  %v1793_v34 = vsel %vm78_vm0, 0.0, %v1788_v26 }
 0xbc8   :  { %v1782_v25 = vpop.f32.mrf.mxu0  ;;  %v1800_v21 = vsel %vm3015_vm4, 0.0, %v1793_v34 }
 0xbc9   :  { %v1789_v23 = vrot.slane %v1785_v24, 7  ;;  %v1795_v13 = vrot.slane %v1785_v24, 1  ;;  %2050 = vrot.lane.b32.xlu1 %v3356_v48, %s2394_s11  ;;  %1806 = vrot.lane.b32.xlu0 %v1785_v24, %s2391_s28  ;;  %v2062_v48 = vld [vmem:[%s3894_s10 + $0x10] sm:$0xff] }
 0xbcb   :  { %v1796_v29 = vsel %vm91_vm1, %v1794_v27, %v1795_v13  ;;  %v1790_v31 = vsel %vm78_vm0, %v1788_v26, %v1789_v23  ;;  %v1799_v33 = vsel %vm91_vm1, %v1795_v13, 0.0  ;;  %vm2039_vm1 = vcmp.eq.s32.totalorder %v2038_v19, 0 }
 0xbcc   :  { %v1802_v17 = vsel %vm2998_vm14, 0.0, %v1796_v29  ;;  %v1803_v37 = vsel %vm3009_vm15, 0.0, %v1799_v33  ;;  %v1801_v44 = vsel %vm3025_vm5, 0.0, %v1790_v31  ;;  %v2048_v61 = vsel %vm2039_vm1, 0.0, %v2043_v59 }
 0xbcd   :  { %1932 = vrot.lane.b32.xlu1 %v3432_v20, %s2391_s28  ;;  %2054 = vrot.lane.b32.xlu0 %v2049_v32, %s2391_s28  ;;  %v1812_v47 = vsel %vm124_vm2, %v1802_v17, 1.0  ;;  %v1813_v42 = vsel %vm124_vm2, %v1803_v37, 1.0  ;;  %v2070_v20 = vld [vmem:[%s3894_s10 + $0x50] sm:$0xff] }
 0xbce   :  { %2205 = vmatprep.mubr.msk.f32.mxu1 %vm158_vm3, %v1812_v47 }
 0xc37   :  { %v1805_v38 = vpop.permute.xlu1 %1804 }
 0xc38   :  { %v1810_v40 = vsel %vm124_vm2, %v1800_v21, %v1805_v38 }
 0xc39   :  { %1913 = vmatmul.mubr.f32.vlgmr.msra.gmra.mxu1 %v1810_v40 }
 0xc3a   :  { %2357 = vmatpush3.msk.msra.mxu1 %vm78_vm0, %v2072_v39  ;;  %2206 = vmatprep.mubr.msk.f32.mxu1 %vm158_vm3, %v1813_v42 }
 0xc3b   :  { %2358 = vmatprep.subr.mxu1 %v2390_v3  ;;  %v2051_v30 = vpop.permute.xlu1 %2050  ;;  %v1807_v43 = vpop.permute.xlu0 %1806 }
 0xc3c   :  { %2359 = vmatpush3.msra.mxu1 %v2071_v28  ;;  %v1811_v45 = vsel %vm124_vm2, %v1801_v44, %v1807_v43  ;;  %v2057_v46 = vsel %vm301_vm10, %v2048_v61, %v2051_v30 }
 0xc3d   :  { %2360 = vmatprep.subr.mxu1 %v2390_v3  ;;  %1918 = vmatmul.mubr.f32.gmra.mxu1 %v1811_v45 }
 0xc3e   :  { %2361 = vmatpush3.msra.mxu1 %v2070_v20  ;;  %2382 = vmatprep.mubr.msk.f32.mxu1 %vm2393_vm7, %v2390_v3 }
 0xc3f   :  { %2362 = vmatprep.subr.mxu1 %v2390_v3  ;;  %v1933_v51 = vpop.permute.xlu1 %1932  ;;  %v2055_v60 = vpop.permute.xlu0 %2054 }
 0xc40   :  { %v1935_v53 = vsel %vm124_vm2, %v1930_v36, %v1933_v51  ;;  %2363 = vmatpush3.msra.mxu1 %v2069_v50  ;;  %v2058_v1 = vsel %vm124_vm2, %v2057_v46, %v2055_v60 }
 0xc41   :  { %2364 = vmatprep.subr.mxu1 %v2390_v3  ;;  %2033 = vmatmul.mubr.f32.vlgmr.msra.gmra.mxu0 %v1935_v53  ;;  %v2059_v4 = vsel %vm1471_vm11, %v2058_v1, 1.0 }
 0xc42   :  { %2365 = vmatpush3.msra.mxu1 %v2068_v52 }
 0xc43   :  { %2366 = vmatprep.subr.mxu1 %v2390_v3 }
 0xc44   :  { %2367 = vmatpush3.msra.mxu1 %v2067_v54 }
 0xc45   :  { %2368 = vmatprep.subr.mxu1 %v2390_v3 }
 0xc46   :  { %2369 = vmatpush3.msra.mxu1 %v2066_v7 }
 0xc47   :  { %2370 = vmatprep.subr.mxu1 %v2390_v3 }
 0xc48   :  { %2371 = vmatpush3.msra.mxu1 %v2065_v55 }
 0xc49   :  { %2372 = vmatprep.subr.mxu1 %v2390_v3 }
 0xc4a   :  { %2373 = vmatpush3.msra.mxu1 %v2064_v57 }
 0xc4b   :  { %2374 = vmatprep.subr.mxu1 %v2390_v3 }
 0xc4c   :  { %2375 = vmatpush3.msra.mxu1 %v2063_v58 }
 0xc4d   :  { %2376 = vmatprep.subr.mxu1 %v2390_v3 }
 0xc4e   :  { %2377 = vmatpush3.msra.mxu1 %v2062_v48 }
 0xc4f   :  { %2378 = vmatprep.subr.mxu1 %v2390_v3 }
 0xc50   :  { %2379 = vmatpush3.msra.mxu1 %v2061_v62 }
 0xc51   :  { %2380 = vmatprep.subr.mxu1 %v2390_v3 }
 0xc52   :  { %2381 = vmatpush3.msra.mxu1 %v2060_v2 }
 0xc53   :  { %2383 = vmatmul.mubr.msk.f32.vlgmr.msra.gmra.mxu1 %vm1486_vm8, %v2059_v4 }
 0xcf9   :  { %v1914_v5 = vpop.f32.mrf.mxu1 }
 0xcfa   :  { %2149 = vst [vmem:[%s3895_s16] sm:$0xff] %v1914_v5 }
 0xcfb   :  { %v1916_v6 = vpop.f32.mrf.mxu1 }
 0xcfd   :  { %v1919_v8 = vpop.f32.mrf.mxu1 }
 0xcfe   :  { %2150 = vst [vmem:[%s3895_s16 + $0x8] sm:$0xff] %v1919_v8 }
 0xcff   :  { %v1921_v9 = vpop.f32.mrf.mxu1 }
 0xd01   :  { %v2034_v10 = vpop.f32.mrf.mxu0 }
 0xd02   :  { %2151 = vst [vmem:[%s3895_s16 + $0x10] sm:$0xff] %v2034_v10 }
 0xd03   :  { %v2036_v3 = vpop.f32.mrf.mxu0 }
 0xd13   :  { %v2145_v11 = vpop.f32.mrf.mxu1 }
 0xd14   :  { %2152 = vst [vmem:[%s3895_s16 + $0x18] sm:$0xf] %v2145_v11 }
 0xd15   :  { %v2384_v12 = vpop.f32.mrf.mxu1 }

</bundles_post_ra>
